<compile_context>
chip_gen: v6e
topology: v6e:2x2x1
jax: 0.10.0
libtpu: 0.0.40
codegen_flags: <defaults>
</compile_context>

<pallas_src>
import functools

import jax
import jax.numpy as jnp
from jax.experimental import pallas as pl
from jax.experimental.pallas import tpu as pltpu


def _layer_norm(x, gamma, beta, eps=1e-5):
    mu = jnp.mean(x, axis=-1, keepdims=True)
    xc = x - mu
    var = jnp.mean(xc * xc, axis=-1, keepdims=True)
    return xc * jax.lax.rsqrt(var + eps) * gamma + beta


def encoder_layer_kernel(x_ref, wq_ref, wkv_ref, bkv_ref, wo3_ref, w1_ref, b1_ref,
                         w2_ref, vecs_ref, out_ref, *rest,
                         num_heads, q_tile, compute_dtype, return_attn,
                         attn_dtype, exp_in_bf16):
    if return_attn:
        attn_ref, kv_scr = rest
    else:
        (kv_scr,) = rest

    qi = pl.program_id(1)
    H = num_heads
    L, D = x_ref.shape[1], x_ref.shape[2]
    dh = D // H
    scale = 1.0 / (float(dh) ** 0.5)

    # ---- K/V projection: one (L,D)x(D,2D) MXU pass, cached per batch row -------
    # (Q is projected per query tile below; caching it added scratch + a heavier
    #  first grid step for no FLOP savings.)
    @pl.when(qi == 0)
    def _():
        x_all = x_ref[0].astype(compute_dtype)                          # (L, D)
        kv = jnp.dot(x_all, wkv_ref[...],
                     preferred_element_type=jnp.float32) + bkv_ref[...]  # (L, 2D) f32
        kv = kv.astype(compute_dtype)
        # Head-major relayout once per batch row (static unroll, 2*H small slices).
        # TODO(synk): for L >= ~1K, chunk this projection over L and switch the
        # attention body to flash-style KV tiling (online softmax); also consider
        # a lane-dense (H, dh, L) K^T layout when dh < 128.
        for h in range(H):
            kv_scr[0, h] = kv[:, h * dh:(h + 1) * dh]                    # K_h (L, dh)
            kv_scr[1, h] = kv[:, D + h * dh:D + (h + 1) * dh]            # V_h (L, dh)

    # ---- per-tile Q projection --------------------------------------------------
    q_start = pl.multiple_of(qi * q_tile, q_tile)
    x_q = x_ref[0, pl.ds(q_start, q_tile), :]                            # (tq, D) f32
    bq = vecs_ref[6:7, :]
    q = jnp.dot(x_q.astype(compute_dtype), wq_ref[...],
                preferred_element_type=jnp.float32) + bq                 # (tq, D) f32
    q_cd = q.astype(compute_dtype)
    q3 = jnp.stack([q_cd[:, h * dh:(h + 1) * dh] for h in range(H)],
                   axis=0)                                               # (H, tq, dh)

    k3 = kv_scr[0]                                                       # (H, L, dh)
    v3 = kv_scr[1]                                                       # (H, L, dh)

    # ---- multi-head attention, all heads batched on the MXU ----------------------
    s = jnp.einsum('hqd,hkd->hqk', q3, k3,
                   preferred_element_type=jnp.float32) * scale           # (H, tq, L)
    s = s - jnp.max(s, axis=-1, keepdims=True)
    if exp_in_bf16:
        # bf16 EUP exp (v6e/v7x); sum / rescale stay in f32.
        e = jnp.exp(s.astype(jnp.bfloat16)).astype(jnp.float32)
    else:
        e = jnp.exp(s)
    a = e * pl.reciprocal(jnp.sum(e, axis=-1, keepdims=True), approx=True)
    if return_attn:
        attn_ref[0] = a.astype(attn_dtype)                               # one block store

    ctx = jnp.einsum('hqk,hkd->hqd', a.astype(compute_dtype), v3,
                     preferred_element_type=jnp.float32)                 # (H, tq, dh)
    ctx_cd = ctx.astype(compute_dtype)

    # Output projection with no head concat and no (H, tq, D) intermediate:
    # H per-head (tq,dh)x(dh,D) matmuls accumulated in f32 (static unroll).
    wo3 = wo3_ref[...]
    en_x = jnp.dot(ctx_cd[0], wo3[0], preferred_element_type=jnp.float32)
    for h in range(1, H):
        en_x = en_x + jnp.dot(ctx_cd[h], wo3[h], preferred_element_type=jnp.float32)

    bo, b2 = vecs_ref[0:1, :], vecs_ref[1:2, :]
    g1, be1 = vecs_ref[2:3, :], vecs_ref[3:4, :]
    g2, be2 = vecs_ref[4:5, :], vecs_ref[5:6, :]
    en_x = en_x + bo

    # --- residual + LayerNorm1 ----------------------------------------------------
    # TODO(synk): dropout is modeled as identity (eval-mode semantics).
    y = _layer_norm(x_q + en_x, g1, be1)

    # --- FFN: Conv1d(kernel_size=1) == matmul over channels, relu ------------------
    h1 = jnp.dot(y.astype(compute_dtype), w1_ref[...],
                 preferred_element_type=jnp.float32) + b1_ref[...]
    h1 = jnp.maximum(h1, 0.0)
    z = jnp.dot(h1.astype(compute_dtype), w2_ref[...],
                preferred_element_type=jnp.float32) + b2

    # --- residual + LayerNorm2 ------------------------------------------------------
    out_ref[0] = _layer_norm(y + z, g2, be2)


def pack_params(p):
    """Pack the module's 16 small parameter arrays into a few lane-aligned arrays."""
    D = p["wq"].shape[0]
    wkv = jnp.concatenate([p["wk"], p["wv"]], axis=1)                    # (D, 2D)
    bkv = jnp.concatenate([p["bk"], p["bv"]], axis=1)                    # (1, 2D)
    vecs = jnp.concatenate([p["bo"], p["b2"], p["g1"], p["be1"],
                            p["g2"], p["be2"], p["bq"],
                            jnp.zeros((1, D), jnp.float32)], axis=0)     # (8, D)
    return {"wq": p["wq"], "wkv": wkv, "bkv": bkv, "wo": p["wo"],
            "w1": p["w1"], "b1": p["b1"], "w2": p["w2"], "vecs": vecs}


def _vmem_budget_bytes(L, D, d_ff, H, dh, q_tile, cd, return_attn, attn_dtype):
    """Estimated VMEM footprint (double-buffered blocks + scratch + live set)."""
    f32b = 4
    cdb = jnp.dtype(cd).itemsize
    attnb = jnp.dtype(attn_dtype).itemsize
    b = 0
    b += 2 * L * D * f32b                          # x block (double-buffered)
    b += 2 * q_tile * D * f32b                     # out block
    if return_attn:
        b += 2 * H * q_tile * L * attnb            # attention output block
    w_elems = D * D + D * 2 * D + H * dh * D + D * d_ff + d_ff * D
    b += 2 * (w_elems * cdb + (2 * D + d_ff + 8 * D) * f32b)   # weights / biases
    b += 2 * H * L * dh * cdb                      # K/V scratch (head-major)
    b += 3 * H * q_tile * L * f32b                 # live scores / probs
    b += 2 * q_tile * max(D, d_ff) * f32b          # FFN intermediates
    b += 4 << 20                                   # Mosaic internal slack
    return b


def encoder_layer(x, params, num_heads, *, q_tile=None,
                  compute_dtype=jnp.bfloat16, return_attn=False,
                  attn_dtype=None, exp_in_bf16=None):
    B, L, D = x.shape
    H = num_heads
    assert D % H == 0
    dh = D // H
    d_ff = params["w1"].shape[1]

    if attn_dtype is None:
        attn_dtype = compute_dtype            # bf16 halves the dominant HBM write
    if exp_in_bf16 is None:
        # bf16 EUP exists on v6e/v7x; keep f32 exp on v5e (pass exp_in_bf16=False).
        exp_in_bf16 = compute_dtype == jnp.bfloat16
    if q_tile is None:
        # 128 saturates the v5e MXU; pass q_tile=256 on v6e/v7x (re-check VMEM).
        q_tile = L if L <= 128 else 128
    assert L % q_tile == 0 and (q_tile % 8 == 0 or q_tile == L)
    n_qt = L // q_tile

    cd = compute_dtype
    f32 = jnp.float32
    # Matmul operands in compute_dtype (bf16 on v6e/v7x); vector params stay f32.
    wq = params["wq"].astype(cd)
    wkv = params["wkv"].astype(cd)
    wo3 = params["wo"].reshape(H, dh, D).astype(cd)   # head-major out-proj blocks
    w1 = params["w1"].astype(cd)
    w2 = params["w2"].astype(cd)
    bkv = params["bkv"].astype(f32)
    b1 = params["b1"].astype(f32)
    vecs = params["vecs"].astype(f32)

    kernel = functools.partial(encoder_layer_kernel, num_heads=H, q_tile=q_tile,
                               compute_dtype=cd, return_attn=return_attn,
                               attn_dtype=attn_dtype, exp_in_bf16=exp_in_bf16)

    in_specs = [
        pl.BlockSpec((1, L, D), lambda b, i: (b, 0, 0)),      # x (full seq per row)
        pl.BlockSpec((D, D), lambda b, i: (0, 0)),            # Q weight
        pl.BlockSpec((D, 2 * D), lambda b, i: (0, 0)),        # fused K/V weight
        pl.BlockSpec((1, 2 * D), lambda b, i: (0, 0)),        # fused K/V bias
        pl.BlockSpec((H, dh, D), lambda b, i: (0, 0, 0)),     # out-proj (head-major)
        pl.BlockSpec((D, d_ff), lambda b, i: (0, 0)),         # conv_one weight
        pl.BlockSpec((1, d_ff), lambda b, i: (0, 0)),         # conv_one bias
        pl.BlockSpec((d_ff, D), lambda b, i: (0, 0)),         # conv_two weight
        pl.BlockSpec((8, D), lambda b, i: (0, 0)),            # bias / LN / bq slab
    ]
    out_sds = jax.ShapeDtypeStruct((B, L, D), f32)
    out_spec = pl.BlockSpec((1, q_tile, D), lambda b, i: (b, i, 0))
    if return_attn:
        out_shape = (out_sds, jax.ShapeDtypeStruct((B, H, L, L), attn_dtype))
        out_specs = (out_spec,
                     pl.BlockSpec((1, H, q_tile, L), lambda b, i: (b, 0, i, 0)))
    else:
        out_shape = out_sds
        out_specs = out_spec

    # Computed VMEM budget, capped below physical capacity (v7x has only 64 MiB).
    budget = _vmem_budget_bytes(L, D, d_ff, H, dh, q_tile, cd, return_attn, attn_dtype)
    try:
        phys = int(getattr(pltpu.get_tpu_info(), "vmem_capacity_bytes", 64 << 20))
    except Exception:
        phys = 64 << 20
    vmem_limit = max(16 << 20, min(budget, int(phys * 0.85)))

    return pl.pallas_call(
        kernel,
        out_shape=out_shape,
        grid=(B, n_qt),
        in_specs=in_specs,
        out_specs=out_specs,
        scratch_shapes=[pltpu.VMEM((2, H, L, dh), cd)],   # cached K, V (head-major)
        compiler_params=pltpu.CompilerParams(
            dimension_semantics=("parallel", "arbitrary"),
            vmem_limit_bytes=vmem_limit),
    )(x, wq, wkv, bkv, wo3, w1, b1, w2, vecs)


def _reference(x, p, num_heads):
    """Pure-JAX reference for correctness checking."""
    B, L, D = x.shape
    dh = D // num_heads
    q = x @ p["wq"] + p["bq"]
    k = x @ p["wk"] + p["bk"]
    v = x @ p["wv"] + p["bv"]
    q = q.reshape(B, L, num_heads, dh).transpose(0, 2, 1, 3)
    k = k.reshape(B, L, num_heads, dh).transpose(0, 2, 1, 3)
    v = v.reshape(B, L, num_heads, dh).transpose(0, 2, 1, 3)
    s = jnp.einsum("bhqd,bhkd->bhqk", q, k) / jnp.sqrt(jnp.float32(dh))
    a = jax.nn.softmax(s, axis=-1)
    ctx = jnp.einsum("bhqk,bhkd->bhqd", a, v).transpose(0, 2, 1, 3).reshape(B, L, D)
    en_x = ctx @ p["wo"] + p["bo"]

    def ln(t, g, b):
        mu = jnp.mean(t, axis=-1, keepdims=True)
        var = jnp.mean((t - mu) ** 2, axis=-1, keepdims=True)
        return (t - mu) * jax.lax.rsqrt(var + 1e-5) * g + b

    y = ln(x + en_x, p["g1"], p["be1"])
    h1 = jnp.maximum(y @ p["w1"] + p["b1"], 0.0)
    z = h1 @ p["w2"] + p["b2"]
    return ln(y + z, p["g2"], p["be2"]), a


if __name__ == "__main__":
    B, L, D, H = 2, 16, 32, 4
    d_ff = 4 * D  # default d_ff = 4 * d_model

    key = jax.random.PRNGKey(0)
    ks = jax.random.split(key, 16)

    def nrm(k, shape, scale=0.05):
        return scale * jax.random.normal(k, shape, dtype=jnp.float32)

    raw = {
        "wq": nrm(ks[0], (D, D)),  "bq": nrm(ks[1], (1, D)),
        "wk": nrm(ks[2], (D, D)),  "bk": nrm(ks[3], (1, D)),
        "wv": nrm(ks[4], (D, D)),  "bv": nrm(ks[5], (1, D)),
        "wo": nrm(ks[6], (D, D)),  "bo": nrm(ks[7], (1, D)),
        # conv_one / conv_two: PyTorch Conv1d stores (out, in, 1); weights here are
        # pre-transposed to matmul form (in, out) — enforced by this harness.
        "w1": nrm(ks[8], (D, d_ff)),  "b1": nrm(ks[9], (1, d_ff)),
        "w2": nrm(ks[10], (d_ff, D)), "b2": nrm(ks[11], (1, D)),
        "g1": jnp.ones((1, D), jnp.float32),  "be1": jnp.zeros((1, D), jnp.float32),
        "g2": jnp.ones((1, D), jnp.float32),  "be2": jnp.zeros((1, D), jnp.float32),
    }
    x = jax.random.normal(ks[12], (B, L, D), dtype=jnp.float32)

    packed = pack_params(raw)
    ref_out, ref_attn = _reference(x, raw, H)

    # f32 MXU path, query-tiled (2 tiles of 8 rows), f32 attention matrix returned.
    out, attn = encoder_layer(x, packed, H, q_tile=8,
                              compute_dtype=jnp.float32, return_attn=True,
                              attn_dtype=jnp.float32)
    jax.block_until_ready((out, attn))
    assert out.shape == (B, L, D) and attn.shape == (B, H, L, L)
    assert jnp.allclose(out, ref_out, atol=5e-3, rtol=5e-3)
    assert jnp.allclose(attn, ref_attn, atol=5e-3, rtol=5e-3)

    # bf16 MXU-operand path (v6e/v7x perf config), attention output dropped.
    out_bf = encoder_layer(x, packed, H, compute_dtype=jnp.bfloat16,
                           return_attn=False)
    out_bf = jax.block_until_ready(out_bf)
    assert out_bf.shape == (B, L, D)
    assert jnp.allclose(out_bf, ref_out, atol=5e-2, rtol=5e-2)

    print("KERNEL_OK")
</pallas_src>

<mosaic_0001>
module attributes {stable_mosaic.version = 11 : i64} {
  func.func @encoder_layer_kernel(%arg0: i32, %arg1: i32, %arg2: memref<1x16x32xf32, #tpu.memory_space<vmem>>, %arg3: memref<32x32xf32, #tpu.memory_space<vmem>>, %arg4: memref<32x64xf32, #tpu.memory_space<vmem>>, %arg5: memref<1x64xf32, #tpu.memory_space<vmem>>, %arg6: memref<4x8x32xf32, #tpu.memory_space<vmem>>, %arg7: memref<32x128xf32, #tpu.memory_space<vmem>>, %arg8: memref<1x128xf32, #tpu.memory_space<vmem>>, %arg9: memref<128x32xf32, #tpu.memory_space<vmem>>, %arg10: memref<8x32xf32, #tpu.memory_space<vmem>>, %arg11: memref<1x8x32xf32, #tpu.memory_space<vmem>>, %arg12: memref<1x4x8x16xf32, #tpu.memory_space<vmem>>, %arg13: memref<2x4x16x8xf32, #tpu.memory_space<vmem>>) attributes {dimension_semantics = [#tpu.dimension_semantics<parallel>, #tpu.dimension_semantics<arbitrary>], iteration_bounds = array<i64: 2, 2>, scalar_prefetch = 0 : i64, scratch_operands = 1 : i64, tpu.core_type = #tpu.core_type<tc>, window_params = [{transform_indices = @transform_0, window_bounds = array<i64: 1, 16, 32>}, {pipeline_mode = #tpu.pipeline_mode<synchronous>, transform_indices = @transform_1, window_bounds = array<i64: 32, 32>}, {pipeline_mode = #tpu.pipeline_mode<synchronous>, transform_indices = @transform_2, window_bounds = array<i64: 32, 64>}, {pipeline_mode = #tpu.pipeline_mode<synchronous>, transform_indices = @transform_3, window_bounds = array<i64: 1, 64>}, {pipeline_mode = #tpu.pipeline_mode<synchronous>, transform_indices = @transform_4, window_bounds = array<i64: 4, 8, 32>}, {pipeline_mode = #tpu.pipeline_mode<synchronous>, transform_indices = @transform_5, window_bounds = array<i64: 32, 128>}, {pipeline_mode = #tpu.pipeline_mode<synchronous>, transform_indices = @transform_6, window_bounds = array<i64: 1, 128>}, {pipeline_mode = #tpu.pipeline_mode<synchronous>, transform_indices = @transform_7, window_bounds = array<i64: 128, 32>}, {pipeline_mode = #tpu.pipeline_mode<synchronous>, transform_indices = @transform_8, window_bounds = array<i64: 8, 32>}, {transform_indices = @transform_9, window_bounds = array<i64: 1, 8, 32>}, {transform_indices = @transform_10, window_bounds = array<i64: 1, 4, 8, 16>}]} {
    %c0_i32 = arith.constant 0 : i32
    %0 = arith.cmpi eq, %arg1, %c0_i32 : i32
    %1 = arith.extui %0 : i1 to i32
    %c0_i32_0 = arith.constant 0 : i32
    %2 = arith.cmpi ne, %1, %c0_i32_0 : i32
    scf.if %2 {
      %c0_58 = arith.constant 0 : index
      %c0_59 = arith.constant 0 : index
      %c0_60 = arith.constant 0 : index
      %131 = vector.load %arg2[%c0_58, %c0_59, %c0_60] : memref<1x16x32xf32, #tpu.memory_space<vmem>>, vector<1x16x32xf32>
      %132 = vector.shape_cast %131 : vector<1x16x32xf32> to vector<16x32xf32>
      %c0_61 = arith.constant 0 : index
      %c0_62 = arith.constant 0 : index
      %133 = vector.load %arg4[%c0_61, %c0_62] : memref<32x64xf32, #tpu.memory_space<vmem>>, vector<32x64xf32>
      %cst_63 = arith.constant dense<0.000000e+00> : vector<16x64xf32>
      %134 = tpu.matmul %132, %133, %cst_63 {dimension_numbers = #tpu.dot_dimension_numbers<[1], [0], [0], [1], [0, 0, 1, 1], [], []>} : vector<16x32xf32>, vector<32x64xf32>, vector<16x64xf32> -> vector<16x64xf32>
      %c0_64 = arith.constant 0 : index
      %c0_65 = arith.constant 0 : index
      %135 = vector.load %arg5[%c0_64, %c0_65] : memref<1x64xf32, #tpu.memory_space<vmem>>, vector<1x64xf32>
      %136 = vector.broadcast %135 : vector<1x64xf32> to vector<16x64xf32>
      %137 = arith.addf %134, %136 : vector<16x64xf32>
      %138 = vector.extract_strided_slice %137 {offsets = [0, 0], sizes = [16, 8], strides = [1, 1]} : vector<16x64xf32> to vector<16x8xf32>
      %c0_66 = arith.constant 0 : index
      %c0_67 = arith.constant 0 : index
      %c0_68 = arith.constant 0 : index
      %c0_69 = arith.constant 0 : index
      %139 = vector.load %arg13[%c0_66, %c0_67, %c0_68, %c0_69] : memref<2x4x16x8xf32, #tpu.memory_space<vmem>>, vector<1x1x16x8xf32>
      %140 = vector.shape_cast %139 : vector<1x1x16x8xf32> to vector<16x8xf32>
      %141 = vector.shape_cast %138 : vector<16x8xf32> to vector<1x1x16x8xf32>
      tpu.vector_store %arg13[%c0_66, %c0_67, %c0_68, %c0_69], %141 {strides = array<i32>} : memref<2x4x16x8xf32, #tpu.memory_space<vmem>>, vector<1x1x16x8xf32>,
      %142 = vector.extract_strided_slice %137 {offsets = [0, 32], sizes = [16, 8], strides = [1, 1]} : vector<16x64xf32> to vector<16x8xf32>
      %c1_70 = arith.constant 1 : index
      %c0_71 = arith.constant 0 : index
      %c0_72 = arith.constant 0 : index
      %c0_73 = arith.constant 0 : index
      %143 = vector.load %arg13[%c1_70, %c0_71, %c0_72, %c0_73] : memref<2x4x16x8xf32, #tpu.memory_space<vmem>>, vector<1x1x16x8xf32>
      %144 = vector.shape_cast %143 : vector<1x1x16x8xf32> to vector<16x8xf32>
      %145 = vector.shape_cast %142 : vector<16x8xf32> to vector<1x1x16x8xf32>
      tpu.vector_store %arg13[%c1_70, %c0_71, %c0_72, %c0_73], %145 {strides = array<i32>} : memref<2x4x16x8xf32, #tpu.memory_space<vmem>>, vector<1x1x16x8xf32>,
      %146 = vector.extract_strided_slice %137 {offsets = [0, 8], sizes = [16, 8], strides = [1, 1]} : vector<16x64xf32> to vector<16x8xf32>
      %c0_74 = arith.constant 0 : index
      %c1_75 = arith.constant 1 : index
      %c0_76 = arith.constant 0 : index
      %c0_77 = arith.constant 0 : index
      %147 = vector.load %arg13[%c0_74, %c1_75, %c0_76, %c0_77] : memref<2x4x16x8xf32, #tpu.memory_space<vmem>>, vector<1x1x16x8xf32>
      %148 = vector.shape_cast %147 : vector<1x1x16x8xf32> to vector<16x8xf32>
      %149 = vector.shape_cast %146 : vector<16x8xf32> to vector<1x1x16x8xf32>
      tpu.vector_store %arg13[%c0_74, %c1_75, %c0_76, %c0_77], %149 {strides = array<i32>} : memref<2x4x16x8xf32, #tpu.memory_space<vmem>>, vector<1x1x16x8xf32>,
      %150 = vector.extract_strided_slice %137 {offsets = [0, 40], sizes = [16, 8], strides = [1, 1]} : vector<16x64xf32> to vector<16x8xf32>
      %c1_78 = arith.constant 1 : index
      %c1_79 = arith.constant 1 : index
      %c0_80 = arith.constant 0 : index
      %c0_81 = arith.constant 0 : index
      %151 = vector.load %arg13[%c1_78, %c1_79, %c0_80, %c0_81] : memref<2x4x16x8xf32, #tpu.memory_space<vmem>>, vector<1x1x16x8xf32>
      %152 = vector.shape_cast %151 : vector<1x1x16x8xf32> to vector<16x8xf32>
      %153 = vector.shape_cast %150 : vector<16x8xf32> to vector<1x1x16x8xf32>
      tpu.vector_store %arg13[%c1_78, %c1_79, %c0_80, %c0_81], %153 {strides = array<i32>} : memref<2x4x16x8xf32, #tpu.memory_space<vmem>>, vector<1x1x16x8xf32>,
      %154 = vector.extract_strided_slice %137 {offsets = [0, 16], sizes = [16, 8], strides = [1, 1]} : vector<16x64xf32> to vector<16x8xf32>
      %c0_82 = arith.constant 0 : index
      %c2_83 = arith.constant 2 : index
      %c0_84 = arith.constant 0 : index
      %c0_85 = arith.constant 0 : index
      %155 = vector.load %arg13[%c0_82, %c2_83, %c0_84, %c0_85] : memref<2x4x16x8xf32, #tpu.memory_space<vmem>>, vector<1x1x16x8xf32>
      %156 = vector.shape_cast %155 : vector<1x1x16x8xf32> to vector<16x8xf32>
      %157 = vector.shape_cast %154 : vector<16x8xf32> to vector<1x1x16x8xf32>
      tpu.vector_store %arg13[%c0_82, %c2_83, %c0_84, %c0_85], %157 {strides = array<i32>} : memref<2x4x16x8xf32, #tpu.memory_space<vmem>>, vector<1x1x16x8xf32>,
      %158 = vector.extract_strided_slice %137 {offsets = [0, 48], sizes = [16, 8], strides = [1, 1]} : vector<16x64xf32> to vector<16x8xf32>
      %c1_86 = arith.constant 1 : index
      %c2_87 = arith.constant 2 : index
      %c0_88 = arith.constant 0 : index
      %c0_89 = arith.constant 0 : index
      %159 = vector.load %arg13[%c1_86, %c2_87, %c0_88, %c0_89] : memref<2x4x16x8xf32, #tpu.memory_space<vmem>>, vector<1x1x16x8xf32>
      %160 = vector.shape_cast %159 : vector<1x1x16x8xf32> to vector<16x8xf32>
      %161 = vector.shape_cast %158 : vector<16x8xf32> to vector<1x1x16x8xf32>
      tpu.vector_store %arg13[%c1_86, %c2_87, %c0_88, %c0_89], %161 {strides = array<i32>} : memref<2x4x16x8xf32, #tpu.memory_space<vmem>>, vector<1x1x16x8xf32>,
      %162 = vector.extract_strided_slice %137 {offsets = [0, 24], sizes = [16, 8], strides = [1, 1]} : vector<16x64xf32> to vector<16x8xf32>
      %c0_90 = arith.constant 0 : index
      %c3_91 = arith.constant 3 : index
      %c0_92 = arith.constant 0 : index
      %c0_93 = arith.constant 0 : index
      %163 = vector.load %arg13[%c0_90, %c3_91, %c0_92, %c0_93] : memref<2x4x16x8xf32, #tpu.memory_space<vmem>>, vector<1x1x16x8xf32>
      %164 = vector.shape_cast %163 : vector<1x1x16x8xf32> to vector<16x8xf32>
      %165 = vector.shape_cast %162 : vector<16x8xf32> to vector<1x1x16x8xf32>
      tpu.vector_store %arg13[%c0_90, %c3_91, %c0_92, %c0_93], %165 {strides = array<i32>} : memref<2x4x16x8xf32, #tpu.memory_space<vmem>>, vector<1x1x16x8xf32>,
      %166 = vector.extract_strided_slice %137 {offsets = [0, 56], sizes = [16, 8], strides = [1, 1]} : vector<16x64xf32> to vector<16x8xf32>
      %c1_94 = arith.constant 1 : index
      %c3_95 = arith.constant 3 : index
      %c0_96 = arith.constant 0 : index
      %c0_97 = arith.constant 0 : index
      %167 = vector.load %arg13[%c1_94, %c3_95, %c0_96, %c0_97] : memref<2x4x16x8xf32, #tpu.memory_space<vmem>>, vector<1x1x16x8xf32>
      %168 = vector.shape_cast %167 : vector<1x1x16x8xf32> to vector<16x8xf32>
      %169 = vector.shape_cast %166 : vector<16x8xf32> to vector<1x1x16x8xf32>
      tpu.vector_store %arg13[%c1_94, %c3_95, %c0_96, %c0_97], %169 {strides = array<i32>} : memref<2x4x16x8xf32, #tpu.memory_space<vmem>>, vector<1x1x16x8xf32>,
    } else {
    }
    %c8_i32 = arith.constant 8 : i32
    %3 = arith.muli %arg1, %c8_i32 : i32
    %4 = tpu.assume_multiple %3, 8 : i32
    %c0 = arith.constant 0 : index
    %5 = arith.index_cast %4 : i32 to index
    %c0_1 = arith.constant 0 : index
    %6 = vector.load %arg2[%c0, %5, %c0_1] : memref<1x16x32xf32, #tpu.memory_space<vmem>>, vector<1x8x32xf32>
    %7 = vector.shape_cast %6 : vector<1x8x32xf32> to vector<8x32xf32>
    %c6 = arith.constant 6 : index
    %c0_2 = arith.constant 0 : index
    %8 = vector.load %arg10[%c6, %c0_2] : memref<8x32xf32, #tpu.memory_space<vmem>>, vector<1x32xf32>
    %c0_3 = arith.constant 0 : index
    %c0_4 = arith.constant 0 : index
    %9 = vector.load %arg3[%c0_3, %c0_4] : memref<32x32xf32, #tpu.memory_space<vmem>>, vector<32x32xf32>
    %cst = arith.constant dense<0.000000e+00> : vector<8x32xf32>
    %10 = tpu.matmul %7, %9, %cst {dimension_numbers = #tpu.dot_dimension_numbers<[1], [0], [0], [1], [0, 0, 1, 1], [], []>} : vector<8x32xf32>, vector<32x32xf32>, vector<8x32xf32> -> vector<8x32xf32>
    %11 = vector.broadcast %8 : vector<1x32xf32> to vector<8x32xf32>
    %12 = arith.addf %10, %11 : vector<8x32xf32>
    %13 = vector.extract_strided_slice %12 {offsets = [0, 0], sizes = [8, 8], strides = [1, 1]} : vector<8x32xf32> to vector<8x8xf32>
    %14 = vector.extract_strided_slice %12 {offsets = [0, 8], sizes = [8, 8], strides = [1, 1]} : vector<8x32xf32> to vector<8x8xf32>
    %15 = vector.extract_strided_slice %12 {offsets = [0, 16], sizes = [8, 8], strides = [1, 1]} : vector<8x32xf32> to vector<8x8xf32>
    %16 = vector.extract_strided_slice %12 {offsets = [0, 24], sizes = [8, 8], strides = [1, 1]} : vector<8x32xf32> to vector<8x8xf32>
    %17 = vector.shape_cast %13 : vector<8x8xf32> to vector<1x8x8xf32>
    %18 = vector.shape_cast %14 : vector<8x8xf32> to vector<1x8x8xf32>
    %19 = vector.shape_cast %15 : vector<8x8xf32> to vector<1x8x8xf32>
    %20 = vector.shape_cast %16 : vector<8x8xf32> to vector<1x8x8xf32>
    %21 = tpu.concatenate %17, %18, %19, %20 in 0 : vector<1x8x8xf32>, vector<1x8x8xf32>, vector<1x8x8xf32>, vector<1x8x8xf32> -> vector<4x8x8xf32>
    %c0_5 = arith.constant 0 : index
    %c0_6 = arith.constant 0 : index
    %c0_7 = arith.constant 0 : index
    %c0_8 = arith.constant 0 : index
    %22 = vector.load %arg13[%c0_5, %c0_6, %c0_7, %c0_8] : memref<2x4x16x8xf32, #tpu.memory_space<vmem>>, vector<1x4x16x8xf32>
    %23 = vector.shape_cast %22 : vector<1x4x16x8xf32> to vector<4x16x8xf32>
    %c1 = arith.constant 1 : index
    %c0_9 = arith.constant 0 : index
    %c0_10 = arith.constant 0 : index
    %c0_11 = arith.constant 0 : index
    %24 = vector.load %arg13[%c1, %c0_9, %c0_10, %c0_11] : memref<2x4x16x8xf32, #tpu.memory_space<vmem>>, vector<1x4x16x8xf32>
    %25 = vector.shape_cast %24 : vector<1x4x16x8xf32> to vector<4x16x8xf32>
    "tpu.trace_start"() <{level = 10 : i32, message = "hqd,hkd->hqk"}> : () -> ()
    %cst_12 = arith.constant dense<0.000000e+00> : vector<4x8x16xf32>
    %26 = tpu.matmul %21, %23, %cst_12 {dimension_numbers = #tpu.dot_dimension_numbers<[2], [2], [1], [1], [0, 0, 0, 1, 1, 1], [0], [0]>} : vector<4x8x8xf32>, vector<4x16x8xf32>, vector<4x8x16xf32> -> vector<4x8x16xf32>
    "tpu.trace_stop"() : () -> ()
    %cst_13 = arith.constant 0.353553385 : f32
    %27 = vector.broadcast %cst_13 : f32 to vector<4x8x16xf32>
    %28 = arith.mulf %26, %27 : vector<4x8x16xf32>
    %cst_14 = arith.constant dense<0xFF800000> : vector<4x8xf32>
    %29 = vector.multi_reduction <maximumf>, %28, %cst_14 [2] : vector<4x8x16xf32> to vector<4x8xf32>
    %30 = vector.shape_cast %29 : vector<4x8xf32> to vector<4x8x1xf32>
    %31 = vector.broadcast %30 : vector<4x8x1xf32> to vector<4x8x16xf32>
    %32 = arith.subf %28, %31 : vector<4x8x16xf32>
    %33 = math.exp %32 : vector<4x8x16xf32>
    %cst_15 = arith.constant dense<0.000000e+00> : vector<4x8xf32>
    %34 = vector.multi_reduction <add>, %33, %cst_15 [2] : vector<4x8x16xf32> to vector<4x8xf32>
    %35 = vector.shape_cast %34 : vector<4x8xf32> to vector<4x8x1xf32>
    %36 = tpu.reciprocal %35 {approx = true} : vector<4x8x1xf32> -> vector<4x8x1xf32>
    %37 = vector.broadcast %36 : vector<4x8x1xf32> to vector<4x8x16xf32>
    %38 = arith.mulf %33, %37 : vector<4x8x16xf32>
    %c0_16 = arith.constant 0 : index
    %c0_17 = arith.constant 0 : index
    %c0_18 = arith.constant 0 : index
    %c0_19 = arith.constant 0 : index
    %39 = vector.load %arg12[%c0_16, %c0_17, %c0_18, %c0_19] : memref<1x4x8x16xf32, #tpu.memory_space<vmem>>, vector<1x4x8x16xf32>
    %40 = vector.shape_cast %39 : vector<1x4x8x16xf32> to vector<4x8x16xf32>
    %41 = vector.shape_cast %38 : vector<4x8x16xf32> to vector<1x4x8x16xf32>
    tpu.vector_store %arg12[%c0_16, %c0_17, %c0_18, %c0_19], %41 {strides = array<i32>} : memref<1x4x8x16xf32, #tpu.memory_space<vmem>>, vector<1x4x8x16xf32>,
    "tpu.trace_start"() <{level = 10 : i32, message = "hqk,hkd->hqd"}> : () -> ()
    %cst_20 = arith.constant dense<0.000000e+00> : vector<4x8x8xf32>
    %42 = tpu.matmul %38, %25, %cst_20 {dimension_numbers = #tpu.dot_dimension_numbers<[2], [1], [1], [2], [0, 0, 0, 1, 1, 2], [0], [0]>} : vector<4x8x16xf32>, vector<4x16x8xf32>, vector<4x8x8xf32> -> vector<4x8x8xf32>
    "tpu.trace_stop"() : () -> ()
    %c0_21 = arith.constant 0 : index
    %c0_22 = arith.constant 0 : index
    %c0_23 = arith.constant 0 : index
    %43 = vector.load %arg6[%c0_21, %c0_22, %c0_23] : memref<4x8x32xf32, #tpu.memory_space<vmem>>, vector<4x8x32xf32>
    %44 = vector.extract_strided_slice %42 {offsets = [0, 0, 0], sizes = [1, 8, 8], strides = [1, 1, 1]} : vector<4x8x8xf32> to vector<1x8x8xf32>
    %45 = vector.shape_cast %44 : vector<1x8x8xf32> to vector<8x8xf32>
    %46 = vector.extract_strided_slice %43 {offsets = [0, 0, 0], sizes = [1, 8, 32], strides = [1, 1, 1]} : vector<4x8x32xf32> to vector<1x8x32xf32>
    %47 = vector.shape_cast %46 : vector<1x8x32xf32> to vector<8x32xf32>
    %cst_24 = arith.constant dense<0.000000e+00> : vector<8x32xf32>
    %48 = tpu.matmul %45, %47, %cst_24 {dimension_numbers = #tpu.dot_dimension_numbers<[1], [0], [0], [1], [0, 0, 1, 1], [], []>} : vector<8x8xf32>, vector<8x32xf32>, vector<8x32xf32> -> vector<8x32xf32>
    %49 = vector.extract_strided_slice %42 {offsets = [1, 0, 0], sizes = [1, 8, 8], strides = [1, 1, 1]} : vector<4x8x8xf32> to vector<1x8x8xf32>
    %50 = vector.shape_cast %49 : vector<1x8x8xf32> to vector<8x8xf32>
    %51 = vector.extract_strided_slice %43 {offsets = [1, 0, 0], sizes = [1, 8, 32], strides = [1, 1, 1]} : vector<4x8x32xf32> to vector<1x8x32xf32>
    %52 = vector.shape_cast %51 : vector<1x8x32xf32> to vector<8x32xf32>
    %cst_25 = arith.constant dense<0.000000e+00> : vector<8x32xf32>
    %53 = tpu.matmul %50, %52, %cst_25 {dimension_numbers = #tpu.dot_dimension_numbers<[1], [0], [0], [1], [0, 0, 1, 1], [], []>} : vector<8x8xf32>, vector<8x32xf32>, vector<8x32xf32> -> vector<8x32xf32>
    %54 = arith.addf %48, %53 : vector<8x32xf32>
    %55 = vector.extract_strided_slice %42 {offsets = [2, 0, 0], sizes = [1, 8, 8], strides = [1, 1, 1]} : vector<4x8x8xf32> to vector<1x8x8xf32>
    %56 = vector.shape_cast %55 : vector<1x8x8xf32> to vector<8x8xf32>
    %57 = vector.extract_strided_slice %43 {offsets = [2, 0, 0], sizes = [1, 8, 32], strides = [1, 1, 1]} : vector<4x8x32xf32> to vector<1x8x32xf32>
    %58 = vector.shape_cast %57 : vector<1x8x32xf32> to vector<8x32xf32>
    %cst_26 = arith.constant dense<0.000000e+00> : vector<8x32xf32>
    %59 = tpu.matmul %56, %58, %cst_26 {dimension_numbers = #tpu.dot_dimension_numbers<[1], [0], [0], [1], [0, 0, 1, 1], [], []>} : vector<8x8xf32>, vector<8x32xf32>, vector<8x32xf32> -> vector<8x32xf32>
    %60 = arith.addf %54, %59 : vector<8x32xf32>
    %61 = vector.extract_strided_slice %42 {offsets = [3, 0, 0], sizes = [1, 8, 8], strides = [1, 1, 1]} : vector<4x8x8xf32> to vector<1x8x8xf32>
    %62 = vector.shape_cast %61 : vector<1x8x8xf32> to vector<8x8xf32>
    %63 = vector.extract_strided_slice %43 {offsets = [3, 0, 0], sizes = [1, 8, 32], strides = [1, 1, 1]} : vector<4x8x32xf32> to vector<1x8x32xf32>
    %64 = vector.shape_cast %63 : vector<1x8x32xf32> to vector<8x32xf32>
    %cst_27 = arith.constant dense<0.000000e+00> : vector<8x32xf32>
    %65 = tpu.matmul %62, %64, %cst_27 {dimension_numbers = #tpu.dot_dimension_numbers<[1], [0], [0], [1], [0, 0, 1, 1], [], []>} : vector<8x8xf32>, vector<8x32xf32>, vector<8x32xf32> -> vector<8x32xf32>
    %66 = arith.addf %60, %65 : vector<8x32xf32>
    %c0_28 = arith.constant 0 : index
    %c0_29 = arith.constant 0 : index
    %67 = vector.load %arg10[%c0_28, %c0_29] : memref<8x32xf32, #tpu.memory_space<vmem>>, vector<1x32xf32>
    %c1_30 = arith.constant 1 : index
    %c0_31 = arith.constant 0 : index
    %68 = vector.load %arg10[%c1_30, %c0_31] : memref<8x32xf32, #tpu.memory_space<vmem>>, vector<1x32xf32>
    %c2 = arith.constant 2 : index
    %c0_32 = arith.constant 0 : index
    %69 = vector.load %arg10[%c2, %c0_32] : memref<8x32xf32, #tpu.memory_space<vmem>>, vector<1x32xf32>
    %c3 = arith.constant 3 : index
    %c0_33 = arith.constant 0 : index
    %70 = vector.load %arg10[%c3, %c0_33] : memref<8x32xf32, #tpu.memory_space<vmem>>, vector<1x32xf32>
    %c4 = arith.constant 4 : index
    %c0_34 = arith.constant 0 : index
    %71 = vector.load %arg10[%c4, %c0_34] : memref<8x32xf32, #tpu.memory_space<vmem>>, vector<1x32xf32>
    %c5 = arith.constant 5 : index
    %c0_35 = arith.constant 0 : index
    %72 = vector.load %arg10[%c5, %c0_35] : memref<8x32xf32, #tpu.memory_space<vmem>>, vector<1x32xf32>
    %73 = vector.broadcast %67 : vector<1x32xf32> to vector<8x32xf32>
    %74 = arith.addf %66, %73 : vector<8x32xf32>
    %75 = arith.addf %7, %74 : vector<8x32xf32>
    %cst_36 = arith.constant dense<0.000000e+00> : vector<8xf32>
    %76 = vector.multi_reduction <add>, %75, %cst_36 [1] : vector<8x32xf32> to vector<8xf32>
    %77 = vector.shape_cast %76 : vector<8xf32> to vector<8x1xf32>
    %cst_37 = arith.constant 3.200000e+01 : f32
    %78 = vector.broadcast %cst_37 : f32 to vector<8x1xf32>
    %79 = arith.divf %77, %78 : vector<8x1xf32>
    %80 = vector.broadcast %79 : vector<8x1xf32> to vector<8x32xf32>
    %81 = arith.subf %75, %80 : vector<8x32xf32>
    %82 = arith.mulf %81, %81 : vector<8x32xf32>
    %cst_38 = arith.constant dense<0.000000e+00> : vector<8xf32>
    %83 = vector.multi_reduction <add>, %82, %cst_38 [1] : vector<8x32xf32> to vector<8xf32>
    %84 = vector.shape_cast %83 : vector<8xf32> to vector<8x1xf32>
    %cst_39 = arith.constant 3.200000e+01 : f32
    %85 = vector.broadcast %cst_39 : f32 to vector<8x1xf32>
    %86 = arith.divf %84, %85 : vector<8x1xf32>
    %cst_40 = arith.constant 9.99999974E-6 : f32
    %87 = vector.broadcast %cst_40 : f32 to vector<8x1xf32>
    %88 = arith.addf %86, %87 : vector<8x1xf32>
    %89 = math.rsqrt %88 : vector<8x1xf32>
    %90 = vector.broadcast %89 : vector<8x1xf32> to vector<8x32xf32>
    %91 = arith.mulf %81, %90 : vector<8x32xf32>
    %92 = vector.broadcast %69 : vector<1x32xf32> to vector<8x32xf32>
    %93 = arith.mulf %91, %92 : vector<8x32xf32>
    %94 = vector.broadcast %70 : vector<1x32xf32> to vector<8x32xf32>
    %95 = arith.addf %93, %94 : vector<8x32xf32>
    %c0_41 = arith.constant 0 : index
    %c0_42 = arith.constant 0 : index
    %96 = vector.load %arg7[%c0_41, %c0_42] : memref<32x128xf32, #tpu.memory_space<vmem>>, vector<32x128xf32>
    %cst_43 = arith.constant dense<0.000000e+00> : vector<8x128xf32>
    %97 = tpu.matmul %95, %96, %cst_43 {dimension_numbers = #tpu.dot_dimension_numbers<[1], [0], [0], [1], [0, 0, 1, 1], [], []>} : vector<8x32xf32>, vector<32x128xf32>, vector<8x128xf32> -> vector<8x128xf32>
    %c0_44 = arith.constant 0 : index
    %c0_45 = arith.constant 0 : index
    %98 = vector.load %arg8[%c0_44, %c0_45] : memref<1x128xf32, #tpu.memory_space<vmem>>, vector<1x128xf32>
    %99 = vector.broadcast %98 : vector<1x128xf32> to vector<8x128xf32>
    %100 = arith.addf %97, %99 : vector<8x128xf32>
    %cst_46 = arith.constant 0.000000e+00 : f32
    %101 = vector.broadcast %cst_46 : f32 to vector<8x128xf32>
    %102 = arith.maximumf %100, %101 : vector<8x128xf32>
    %c0_47 = arith.constant 0 : index
    %c0_48 = arith.constant 0 : index
    %103 = vector.load %arg9[%c0_47, %c0_48] : memref<128x32xf32, #tpu.memory_space<vmem>>, vector<128x32xf32>
    %cst_49 = arith.constant dense<0.000000e+00> : vector<8x32xf32>
    %104 = tpu.matmul %102, %103, %cst_49 {dimension_numbers = #tpu.dot_dimension_numbers<[1], [0], [0], [1], [0, 0, 1, 1], [], []>} : vector<8x128xf32>, vector<128x32xf32>, vector<8x32xf32> -> vector<8x32xf32>
    %105 = vector.broadcast %68 : vector<1x32xf32> to vector<8x32xf32>
    %106 = arith.addf %104, %105 : vector<8x32xf32>
    %107 = arith.addf %95, %106 : vector<8x32xf32>
    %cst_50 = arith.constant dense<0.000000e+00> : vector<8xf32>
    %108 = vector.multi_reduction <add>, %107, %cst_50 [1] : vector<8x32xf32> to vector<8xf32>
    %109 = vector.shape_cast %108 : vector<8xf32> to vector<8x1xf32>
    %cst_51 = arith.constant 3.200000e+01 : f32
    %110 = vector.broadcast %cst_51 : f32 to vector<8x1xf32>
    %111 = arith.divf %109, %110 : vector<8x1xf32>
    %112 = vector.broadcast %111 : vector<8x1xf32> to vector<8x32xf32>
    %113 = arith.subf %107, %112 : vector<8x32xf32>
    %114 = arith.mulf %113, %113 : vector<8x32xf32>
    %cst_52 = arith.constant dense<0.000000e+00> : vector<8xf32>
    %115 = vector.multi_reduction <add>, %114, %cst_52 [1] : vector<8x32xf32> to vector<8xf32>
    %116 = vector.shape_cast %115 : vector<8xf32> to vector<8x1xf32>
    %cst_53 = arith.constant 3.200000e+01 : f32
    %117 = vector.broadcast %cst_53 : f32 to vector<8x1xf32>
    %118 = arith.divf %116, %117 : vector<8x1xf32>
    %cst_54 = arith.constant 9.99999974E-6 : f32
    %119 = vector.broadcast %cst_54 : f32 to vector<8x1xf32>
    %120 = arith.addf %118, %119 : vector<8x1xf32>
    %121 = math.rsqrt %120 : vector<8x1xf32>
    %122 = vector.broadcast %121 : vector<8x1xf32> to vector<8x32xf32>
    %123 = arith.mulf %113, %122 : vector<8x32xf32>
    %124 = vector.broadcast %71 : vector<1x32xf32> to vector<8x32xf32>
    %125 = arith.mulf %123, %124 : vector<8x32xf32>
    %126 = vector.broadcast %72 : vector<1x32xf32> to vector<8x32xf32>
    %127 = arith.addf %125, %126 : vector<8x32xf32>
    %c0_55 = arith.constant 0 : index
    %c0_56 = arith.constant 0 : index
    %c0_57 = arith.constant 0 : index
    %128 = vector.load %arg11[%c0_55, %c0_56, %c0_57] : memref<1x8x32xf32, #tpu.memory_space<vmem>>, vector<1x8x32xf32>
    %129 = vector.shape_cast %128 : vector<1x8x32xf32> to vector<8x32xf32>
    %130 = vector.shape_cast %127 : vector<8x32xf32> to vector<1x8x32xf32>
    tpu.vector_store %arg11[%c0_55, %c0_56, %c0_57], %130 {strides = array<i32>} : memref<1x8x32xf32, #tpu.memory_space<vmem>>, vector<1x8x32xf32>,
    return
  }
  func.func @transform_0(%arg0: i32, %arg1: i32) -> (i32, i32, i32) {
    %c0_i32 = arith.constant 0 : i32
    %c0_i32_0 = arith.constant 0 : i32
    %c0_i32_1 = arith.constant 0 : i32
    return %arg0, %c0_i32, %c0_i32_0 : i32, i32, i32
  }
  func.func @transform_1(%arg0: i32, %arg1: i32) -> (i32, i32) {
    %c0_i32 = arith.constant 0 : i32
    %c0_i32_0 = arith.constant 0 : i32
    %c0_i32_1 = arith.constant 0 : i32
    return %c0_i32, %c0_i32_0 : i32, i32
  }
  func.func @transform_2(%arg0: i32, %arg1: i32) -> (i32, i32) {
    %c0_i32 = arith.constant 0 : i32
    %c0_i32_0 = arith.constant 0 : i32
    %c0_i32_1 = arith.constant 0 : i32
    return %c0_i32, %c0_i32_0 : i32, i32
  }
  func.func @transform_3(%arg0: i32, %arg1: i32) -> (i32, i32) {
    %c0_i32 = arith.constant 0 : i32
    %c0_i32_0 = arith.constant 0 : i32
    %c0_i32_1 = arith.constant 0 : i32
    return %c0_i32, %c0_i32_0 : i32, i32
  }
  func.func @transform_4(%arg0: i32, %arg1: i32) -> (i32, i32, i32) {
    %c0_i32 = arith.constant 0 : i32
    %c0_i32_0 = arith.constant 0 : i32
    %c0_i32_1 = arith.constant 0 : i32
    %c0_i32_2 = arith.constant 0 : i32
    return %c0_i32, %c0_i32_0, %c0_i32_1 : i32, i32, i32
  }
  func.func @transform_5(%arg0: i32, %arg1: i32) -> (i32, i32) {
    %c0_i32 = arith.constant 0 : i32
    %c0_i32_0 = arith.constant 0 : i32
    %c0_i32_1 = arith.constant 0 : i32
    return %c0_i32, %c0_i32_0 : i32, i32
  }
  func.func @transform_6(%arg0: i32, %arg1: i32) -> (i32, i32) {
    %c0_i32 = arith.constant 0 : i32
    %c0_i32_0 = arith.constant 0 : i32
    %c0_i32_1 = arith.constant 0 : i32
    return %c0_i32, %c0_i32_0 : i32, i32
  }
  func.func @transform_7(%arg0: i32, %arg1: i32) -> (i32, i32) {
    %c0_i32 = arith.constant 0 : i32
    %c0_i32_0 = arith.constant 0 : i32
    %c0_i32_1 = arith.constant 0 : i32
    return %c0_i32, %c0_i32_0 : i32, i32
  }
  func.func @transform_8(%arg0: i32, %arg1: i32) -> (i32, i32) {
    %c0_i32 = arith.constant 0 : i32
    %c0_i32_0 = arith.constant 0 : i32
    %c0_i32_1 = arith.constant 0 : i32
    return %c0_i32, %c0_i32_0 : i32, i32
  }
  func.func @transform_9(%arg0: i32, %arg1: i32) -> (i32, i32, i32) {
    %c0_i32 = arith.constant 0 : i32
    %c0_i32_0 = arith.constant 0 : i32
    return %arg0, %arg1, %c0_i32 : i32, i32, i32
  }
  func.func @transform_10(%arg0: i32, %arg1: i32) -> (i32, i32, i32, i32) {
    %c0_i32 = arith.constant 0 : i32
    %c0_i32_0 = arith.constant 0 : i32
    %c0_i32_1 = arith.constant 0 : i32
    return %arg0, %c0_i32, %arg1, %c0_i32_0 : i32, i32, i32, i32
  }
}

</mosaic_0001>

<bundles_post_ra>
// kernel: tpu_custom_call.1
= control target key start
LH: loop header
LB: loop body
LE: loop exit
PB: predicated region body
PF: predicated region fallthrough
CT: control target
= control target key end

     0   :  { %s3002_s0 = inlined_call_operand.vmem [shape: f32[2,16,32], index: 0, kind: input, shape index: {}]   ;;  %s3003_s1 = inlined_call_operand.vmem [shape: f32[32,32], index: 1, kind: input, shape index: {}]   ;;  %s3004_s2 = inlined_call_operand.vmem [shape: f32[32,64], index: 2, kind: input, shape index: {}]   ;;  %s3005_s3 = inlined_call_operand.vmem [shape: f32[1,64], index: 3, kind: input, shape index: {}]   ;;  %s3006_s4 = inlined_call_operand.vmem [shape: f32[4,8,32], index: 4, kind: input, shape index: {}]   ;;  %s3007_s5 = inlined_call_operand.vmem [shape: f32[32,128], index: 5, kind: input, shape index: {}]   ;;  %s3008_s6 = inlined_call_operand.vmem [shape: f32[1,128], index: 6, kind: input, shape index: {}]   ;;  %s3009_s7 = inlined_call_operand.vmem [shape: f32[128,32], index: 7, kind: input, shape index: {}]   ;;  %s3010_s8 = inlined_call_operand.vmem [shape: f32[8,32], index: 8, kind: input, shape index: {}]   ;;  %s3011_s9 = inlined_call_operand.hbm [shape: f32[2,16,32], index: 9, kind: output, shape index: {0}]   ;;  %s3012_s10 = inlined_call_operand.hbm [shape: f32[2,4,16,16], index: 10, kind: output, shape index: {1}]  }
   0x1   :  { %3018 = sst [smem:[#allocation15_spill]] %s3002_s0 }
   0x2   :  { %16 = vsyncpa [#allocation4], 0 }
   0x3   :  { %18 = vsyncpa [#allocation4 + $0x1], 0 }
   0x4   :  { %19 = vsyncpa [#allocation6], 0 }
   0x5   :  { %21 = vsyncpa [#allocation6 + $0x1], 0  ;;  %s2569_s13 = smov 0   ;;  %s2571_s14 = smov 0  }
   0x6   :  { %s2573_s15 = smov 0   ;;  %s2575_s16 = smov 0  }
   0x7   :  { %s2577_s17 = smov 0   ;;  %s2579_s18 = smov 0  }
   0x8   :  { %s2581_s19 = smov 0   ;;  %s2583_s20 = smov 0  }
   0x9 LB: > { %3019 = sst [smem:[#allocation9_spill]] %s2475_s15  ;;  %s2000_s21 = sadd.s32 4294967295, %s2495_s20   ;;  %s2495_s20 = sphi %s2583_s20, %s27_s20   ;;  %s2491_s19 = sphi %s2581_s19, %s3034_s19   ;;  %s2487_s18 = sphi %s2579_s18, %s3033_s18   ;;  %s2483_s17 = sphi %s2577_s17, %s3032_s17   ;;  %s2479_s16 = sphi %s2575_s16, %s3031_s16   ;;  %s2475_s15 = sphi %s2573_s15, %s3030_s15   ;;  %s2471_s14 = sphi %s2571_s14, %s3036_s14   ;;  %s2467_s13 = sphi %s2569_s13, %s3035_s13  }
   0xa   : > { %3020 = sst [smem:[#allocation10_spill]] %s2487_s18  ;;  %s2001_s22 = sadd.s32 4294967294, %s2495_s20  }
   0xb   : > { %3021 = sst [smem:[#allocation11_spill]] %s2491_s19  ;;  %s36_s23 = sadd.s32 1, %s2487_s18 }
   0xc   : > { %p37_p0 = scmp.ge.s32.totalorder %s36_s23, 2  ;;  %s39_s24 = sadd.s32 1, %s2491_s19 }
   0xd   : > { %p252_p1 = scmp.ne.s32.totalorder %s2475_s15, %s2471_s14  ;;  %p253_p2 = scmp.eq.s32.totalorder %s2000_s21, 3 }
   0xe   : > { %s3038_s23 = smov (%p37_p0, %s36_s23), 0  ;;  %s3040_s24 = smov (!%p37_p0, %s39_s24), %s2491_s19 }
   0xf   : > { %3022 = sst [smem:[#allocation12_spill]] %s3038_s23  ;;  %s238_s25 = ssub.s32 %s2487_s18, %s3038_s23 }
  0x10   : > { %p2620_p3 = por %p253_p2, %p252_p1  ;;  %p41_p4 = scmp.ge.s32.totalorder %s3040_s24, 2 }
  0x11   : > { %p258_p5 = scmp.ne.s32.totalorder %s2471_s14, %s2467_s13  ;;  %p259_p6 = scmp.eq.s32.totalorder %s2001_s22, 3 }
  0x12   : > { %p2004_p7 = scmp.ge.s32.totalorder %s2495_s20, 1  ;;  %s3042_s24 = smov (%p41_p4, %s3040_s24), 0 }
  0x13   : > { %3024 = sst [smem:[#allocation13_spill]] %s3042_s24  ;;  %p2629_p8 = por %p259_p6, %p258_p5 }
  0x14   : > { %p337_p9 = scmp.lt.s32.totalorder %s2495_s20, 5  ;;  %s237_s28 = ssub.s32 %s2491_s19, %s3042_s24 }
  0x15   : > { %s242_s29 = sadd.s32 1, %s2475_s15  ;;  %s239_s30 = sor.u32 %s238_s25, %s237_s28 }
  0x16   : > { %p338_p10 = pnand %p2004_p7, %p337_p9  ;;  %p240_p11 = scmp.eq.s32.totalorder %s239_s30, 0 }
  0x17   : > { %s2641_s12 = sand.u32 (!%p338_p10), 1, %s2471_s14   ;;  %p380_p12 = scmp.lt.s32.totalorder (!%p338_p10), %s2483_s17, 1 }
  0x18   : > { %s2638_s11 = scalar_select %p240_p11, %s2475_s15, %s242_s29  }
  0x19   : > { %341 = sbr.rel (%p338_p10) target bundleno = 2629 (0xa45), region = 56  ;;  %s2005_s21 = sshll.u32 (!%p338_p10), %s2641_s12, 3 }
  0x1a   : > { %3026 = sst [smem:[#allocation14_spill]] %s2638_s11  ;;  %s2006_s22 = sshll.u32 (!%p338_p10), %s2641_s12, 5 }
  0x1b   : > { %s3027_s0 = sld [smem:[#allocation15_spill]] (!%p338_p10)  ;;  %s2652_s28 = scalar_lea.vmem (!%p338_p10), [#allocation3], %s2005_s21 }
  0x1c   : > { %s2654_s29 = scalar_lea.vmem (!%p338_p10), [#allocation5], %s2006_s22  ;;  %p2009_p13 = scmp.ne.s32.totalorder (!%p338_p10), %s2479_s16, 0 }
  0x1e   : > { %s381_s23 = scalar_select %p380_p12, %s2483_s17, 1 }
  0x1f   : > { %388 = sbr.rel (%p2009_p13) target bundleno = 380 (0x17c), region = 60  ;;  %s2497_s22 = smov (!%p2009_p13), 120  }
  0x20   : > { %s2052_s18 = sshll.u32 %s381_s23, 4  ;;  %s2498_s30 = smov (!%p2009_p13), 96  }
  0x21   : > { %s2650_s25 = scalar_lea.vmem %s3027_s0, %s2052_s18  ;;  %s2499_s23 = smov (!%p2009_p13), 88  }
  0x22   : > { %s2500_s18 = smov (!%p2009_p13), 112   ;;  %s2501_s19 = smov (!%p2009_p13), 80  }
  0x23   : > { %s2502_s24 = smov (!%p2009_p13), 104   ;;  %s2503_s11 = smov (!%p2009_p13), 72  }
  0x24   : > { %v394_v0 = vld [vmem:[%s3004_s2 + $0x18] sm:$0xff]  ;;  %v393_v1 = vld [vmem:[%s3004_s2 + $0x10] sm:$0xff]  ;;  %vm402_vm0 = vcmask 261120   ;;  %v389_v2 = vld [vmem:[%s2650_s25] sm:$0xff]  ;;  %vm484_vm1 = vcmask 64512  }
  0x25   : > { %2118 = vmatprep.subr.mxu0 %v394_v0  ;;  %v392_v3 = vld [vmem:[%s3004_s2 + $0x8] sm:$0xff]  ;;  %2126 = vmatprep.mubr.msk.f32.mxu0 %vm402_vm0, %v389_v2  ;;  %v391_v4 = vld [vmem:[%s3004_s2] sm:$0xff] }
  0x26   : > { %2119 = vmatpush3.msra.mxu0 %v394_v0  ;;  %v390_v5 = vld [vmem:[%s2650_s25 + $0x8] sm:$0xff]  ;;  %v2010_v6 = vld [vmem:[%s3005_s3] ss:$0 sm:$0xff] }
  0x27   : > { %2120 = vmatprep.subr.mxu0 %v393_v1 }
  0x28   : > { %2121 = vmatpush3.msra.mxu0 %v393_v1 }
  0x29   : > { %2122 = vmatprep.subr.mxu0 %v392_v3 }
  0x2a   : > { %2123 = vmatpush3.msra.mxu0 %v392_v3 }
  0x2b   : > { %2124 = vmatprep.subr.mxu0 %v391_v4 }
  0x2c   : > { %2125 = vmatpush3.msra.mxu0 %v391_v4 }
  0x2d   : > { %2127 = vmatmul.mubr.msk.f32.vlgmr.msra.gmra.mxu0 %vm402_vm0, %v390_v5 }
  0xed   : > { %v2128_v7 = vpop.f32.mrf.mxu0 }
  0xee   : > { %v481_v8 = vadd.f32 %v2128_v7, %v2010_v6 }
  0xef   : > { %v475_v9 = vpop.f32.mrf.mxu0 }
  0xf0   : > { %486 = vst.msk [vmem:[#allocation2 + $0x8] sm:$0xff] %vm484_vm1, %v481_v8  ;;  %v476_v10 = vadd.f32 %v2010_v6, %v475_v9  ;;  %500 = vrot.lane.b32.xlu1 %v481_v8, %s2497_s22  ;;  %491 = vrot.lane.b32.xlu0 %v481_v8, %s2498_s30 }
  0xf2   : > { %485 = vst.msk [vmem:[#allocation2] sm:$0xff] %vm484_vm1, %v476_v10 }
  0xf4   : > { %509 = vrot.lane.b32.xlu1 %v481_v8, %s2499_s23  ;;  %489 = vrot.lane.b32.xlu0 %v476_v10, %s2498_s30 }
  0xf8   : > { %518 = vrot.lane.b32.xlu1 %v481_v8, %s2500_s18  ;;  %507 = vrot.lane.b32.xlu0 %v476_v10, %s2499_s23 }
  0xfc   : > { %527 = vrot.lane.b32.xlu1 %v481_v8, %s2501_s19  ;;  %516 = vrot.lane.b32.xlu0 %v476_v10, %s2500_s18 }
 0x100   : > { %536 = vrot.lane.b32.xlu1 %v481_v8, %s2502_s24  ;;  %525 = vrot.lane.b32.xlu0 %v476_v10, %s2501_s19 }
 0x104   : > { %498 = vrot.lane.b32.xlu1 %v476_v10, %s2497_s22  ;;  %534 = vrot.lane.b32.xlu0 %v476_v10, %s2502_s24 }
 0x108   : > { %545 = vrot.lane.b32.xlu1 %v481_v8, %s2503_s11  ;;  %543 = vrot.lane.b32.xlu0 %v476_v10, %s2503_s11 }
 0x162   : > { %v501_v11 = vpop.permute.xlu1 %500  ;;  %v492_v12 = vpop.permute.xlu0 %491 }
 0x163   : > { %506 = vst.msk [vmem:[#allocation2 + $0x18] sm:$0xff] %vm484_vm1, %v501_v11  ;;  %497 = vst.msk [vmem:[#allocation2 + $0x48] sm:$0xff] %vm484_vm1, %v492_v12 }
 0x166   : > { %v510_v13 = vpop.permute.xlu1 %509  ;;  %v490_v14 = vpop.permute.xlu0 %489 }
 0x167   : > { %515 = vst.msk [vmem:[#allocation2 + $0x58] sm:$0xff] %vm484_vm1, %v510_v13  ;;  %496 = vst.msk [vmem:[#allocation2 + $0x40] sm:$0xff] %vm484_vm1, %v490_v14 }
 0x16a   : > { %v519_v15 = vpop.permute.xlu1 %518  ;;  %v508_v16 = vpop.permute.xlu0 %507 }
 0x16b   : > { %524 = vst.msk [vmem:[#allocation2 + $0x28] sm:$0xff] %vm484_vm1, %v519_v15  ;;  %514 = vst.msk [vmem:[#allocation2 + $0x50] sm:$0xff] %vm484_vm1, %v508_v16 }
 0x16e   : > { %v528_v17 = vpop.permute.xlu1 %527  ;;  %v517_v18 = vpop.permute.xlu0 %516 }
 0x16f   : > { %533 = vst.msk [vmem:[#allocation2 + $0x68] sm:$0xff] %vm484_vm1, %v528_v17  ;;  %523 = vst.msk [vmem:[#allocation2 + $0x20] sm:$0xff] %vm484_vm1, %v517_v18 }
 0x172   : > { %v537_v19 = vpop.permute.xlu1 %536  ;;  %v526_v20 = vpop.permute.xlu0 %525 }
 0x173   : > { %542 = vst.msk [vmem:[#allocation2 + $0x38] sm:$0xff] %vm484_vm1, %v537_v19  ;;  %532 = vst.msk [vmem:[#allocation2 + $0x60] sm:$0xff] %vm484_vm1, %v526_v20 }
 0x176   : > { %v499_v21 = vpop.permute.xlu1 %498  ;;  %v535_v22 = vpop.permute.xlu0 %534 }
 0x177   : > { %505 = vst.msk [vmem:[#allocation2 + $0x10] sm:$0xff] %vm484_vm1, %v499_v21  ;;  %541 = vst.msk [vmem:[#allocation2 + $0x30] sm:$0xff] %vm484_vm1, %v535_v22 }
 0x17a   : > { %v546_v23 = vpop.permute.xlu1 %545  ;;  %v544_v24 = vpop.permute.xlu0 %543 }
 0x17b   : > { %551 = vst.msk [vmem:[#allocation2 + $0x78] sm:$0xff] %vm484_vm1, %v546_v23  ;;  %550 = vst.msk [vmem:[#allocation2 + $0x70] sm:$0xff] %vm484_vm1, %v544_v24 }
 0x17c PF: > { %v559_v25 = vld [vmem:[%s3003_s1 + $0x18] sm:$0xff]  ;;  %s2013_s22 = sshll.u32 %s2479_s16, 3  ;;  %v2504_v26 = vmov 0.0   ;;  %v558_v27 = vld [vmem:[%s3003_s1 + $0x10] sm:$0xff]  ;;  %vm2505_vm2 = vmmov 0   ;;  %v557_v28 = vld [vmem:[%s3003_s1 + $0x8] sm:$0xff] }
 0x17d   : > { %2129 = vmatprep.subr.mxu0 %v2504_v26  ;;  %2137 = vmatprep.mubr.msk.f32.mxu0 %vm2505_vm2, %v2504_v26  ;;  %s553_s24 = scalar_lea.vmem %s2650_s25, %s2013_s22  ;;  %v556_v29 = vld [vmem:[%s3003_s1] sm:$0xff]  ;;  %vm564_vm3 = vcmask 261120   ;;  %v646_v31 = vld [vmem:[#allocation2 + $0x8] sm:$0xff]  ;;  %vm662_vm4 = vcmask 64512   ;;  %v648_v39 = vld [vmem:[#allocation2 + $0x18] sm:$0xff]  ;;  %s2506_s22 = smov 104  }
 0x17e   : > { %2130 = vmatpush3.msra.mxu0 %v559_v25  ;;  %2154 = vmatprep.subr.mxu1 %v2504_v26  ;;  %v2712_v30 = vld [vmem:[%s553_s24] sm:$0xff]  ;;  %v650_v33 = vld [vmem:[#allocation2 + $0x28] sm:$0xff]  ;;  %s2507_s30 = smov 120   ;;  %v647_v40 = vld [vmem:[#allocation2 + $0x10] sm:$0xff]  ;;  %s2508_s23 = smov 112   ;;  %vm979_vm5 = vcmask 130048  }
 0x17f   : > { %2131 = vmatprep.subr.mxu0 %v2504_v26  ;;  %2158 = vmatprep.mubr.msk.f32.mxu1 %vm2505_vm2, %v2504_v26  ;;  %v645_v32 = vld [vmem:[#allocation2] sm:$0xff]  ;;  %v652_v41 = vld [vmem:[#allocation2 + $0x38] sm:$0xff]  ;;  %v651_v43 = vld [vmem:[#allocation2 + $0x30] sm:$0xff]  ;;  %s1889_s19 = sshll.u32 %s2654_s29, 4  ;;  %s2922_s19 = int_to_ptr.vmem [resolvable:$true] %s1889_s19 }
 0x180   : > { %2132 = vmatpush3.msra.mxu0 %v558_v27  ;;  %2155 = vmatpush3.xpose.msk.msra.mxu1 %vm662_vm4, %v650_v33  ;;  %v649_v34 = vld [vmem:[#allocation2 + $0x20] sm:$0xff]  ;;  %v655_v3 = vld [vmem:[#allocation2 + $0x48] sm:$0xff]  ;;  %v657_v20 = vld [vmem:[#allocation2 + $0x58] sm:$0xff]  ;;  %s2373_s21 = scalar_lea.vmem %s2922_s19, 512 }
 0x181   : > { %2133 = vmatprep.subr.mxu0 %v2504_v26  ;;  %2156 = vmatprep.subr.mxu1 %v2504_v26  ;;  %v2014_v35 = vld [vmem:[%s3010_s8 + $0x6] ss:$0 sm:$0xff]  ;;  %v656_v21 = vld [vmem:[#allocation2 + $0x50] sm:$0xff]  ;;  %v659_v25 = vld [vmem:[#allocation2 + $0x68] sm:$0xff]  ;;  %p2374_p0 = scmp.ne.s32.totalorder %s2922_s19, %s2373_s21 }
 0x182   : > { %2134 = vmatpush3.msra.mxu0 %v557_v28  ;;  %v654_v4 = vld [vmem:[#allocation2 + $0x40] sm:$0xff] }
 0x183   : > { %2135 = vmatprep.subr.mxu0 %v2504_v26  ;;  %v658_v27 = vld [vmem:[#allocation2 + $0x60] sm:$0xff]  ;;  %p2375_p1 = pnand %p2374_p0, %p2620_p3 }
 0x184   : > { %2136 = vmatpush3.msra.mxu0 %v556_v29  ;;  %2157 = vmatpush3.xpose.msk.msra.mxu1 %vm662_vm4, %v649_v34  ;;  %v661_v34 = vld [vmem:[#allocation2 + $0x78] sm:$0xff] }
 0x185   : > { %2138 = vmatmul.mubr.msk.f32.vlgmr.msra.gmra.mxu0 %vm564_vm3, %v2712_v30  ;;  %2140 = vmatprep.subr.mxu0 %v2504_v26  ;;  %p2376_p2 = pneg %p2375_p1 }
 0x186   : > { %2141 = vmatpush3.xpose.msk.msra.mxu0 %vm662_vm4, %v646_v31  ;;  %2144 = vmatprep.mubr.msk.f32.mxu0 %vm2505_vm2, %v2504_v26 }
 0x187   : > { %2142 = vmatprep.subr.mxu0 %v2504_v26  ;;  %2175 = vmatprep.subr.mxu1 %v2504_v26 }
 0x18a   : > { %2143 = vmatpush3.xpose.msk.msra.mxu0 %vm662_vm4, %v645_v32 }
 0x18b   : > { %2147 = vmatprep.subr.mxu0 %v2504_v26 }
 0x245   : > { %v634_v36 = vpop.f32.mrf.mxu0 }
 0x246   : > { %v635_v37 = vadd.f32 %v2014_v35, %v634_v36  ;;  %v660_v35 = vld [vmem:[#allocation2 + $0x70] sm:$0xff] }
 0x247   : > { %v2139_v38 = vpop.f32.mrf.mxu0 }
 0x248   : > { %643 = vrot.lane.b32.xlu1 %v635_v37, %s2506_s22  ;;  %639 = vrot.lane.b32.xlu0 %v635_v37, %s2507_s30  ;;  %v1321_v38 = vld [vmem:[%s3006_s4 + $0x8] sm:$0xff]  ;;  %s2048_s30 = sshll.u32 %s2483_s17, 3  ;;  %s2509_s22 = smov [#allocation5]  }
 0x249   : > { %2145 = vmatmul.mubr.msk.f32.vlgmr.msra.gmra.mxu0 %vm662_vm4, %v635_v37 }
 0x24a   : > { %2148 = vmatpush3.xpose.msk.msra.mxu0 %vm662_vm4, %v648_v39  ;;  %2151 = vmatprep.mubr.msk.f32.mxu0 %vm2505_vm2, %v2504_v26 }
 0x24b   : > { %2149 = vmatprep.subr.mxu0 %v2504_v26 }
 0x24c   : > { %641 = vrot.lane.b32.xlu0 %v635_v37, %s2508_s23  ;;  %s1886_s23 = sadd.s32 %s2479_s16, %s2048_s30  ;;  %s2377_s30 = sshll.u32 %s2509_s22, 4  ;;  %s2378_s30 = int_to_ptr.vmem [resolvable:$false] %s2377_s30 }
 0x24d   : > { %s2049_s18 = sshll.u32 %s1886_s23, 7  ;;  %p2380_p4 = scmp.lt.s32.totalorder %s2922_s19, %s2378_s30 }
 0x24e   : > { %2150 = vmatpush3.xpose.msk.msra.mxu0 %vm662_vm4, %v647_v40  ;;  %s2920_s15 = scalar_lea.hbm %s3012_s10, %s2049_s18 }
 0x24f   : > { %2161 = vmatprep.subr.mxu0 %v2504_v26 }
 0x2ba   : > { %v640_v42 = vpop.permute.xlu0 %639  ;;  %v644_v45 = vpop.permute.xlu1 %643 }
 0x2bb   : > { %2152 = vmatmul.mubr.msk.f32.vlgmr.msra.gmra.mxu0 %vm662_vm4, %v640_v42  ;;  %v1323_v42 = vld [vmem:[%s3006_s4 + $0x18] sm:$0xff] }
 0x2bc   : > { %2162 = vmatpush3.xpose.msk.msra.mxu0 %vm662_vm4, %v652_v41  ;;  %2165 = vmatprep.mubr.msk.f32.mxu0 %vm2505_vm2, %v2504_v26  ;;  %v1320_v41 = vld [vmem:[%s3006_s4] sm:$0xff] }
 0x2bd   : > { %2163 = vmatprep.subr.mxu0 %v2504_v26 }
 0x2be   : > { %v642_v44 = vpop.permute.xlu0 %641 }
 0x2bf   : > { %2159 = vmatmul.mubr.msk.f32.vlgmr.msra.gmra.mxu1 %vm662_vm4, %v642_v44 }
 0x2c0   : > { %2164 = vmatpush3.xpose.msk.msra.mxu0 %vm662_vm4, %v651_v43  ;;  %2179 = vmatprep.mubr.msk.f32.mxu1 %vm2505_vm2, %v2504_v26 }
 0x2c1   : > { %2168 = vmatprep.subr.mxu0 %v2504_v26  ;;  %2176 = vmatpush3.msra.mxu1 %v657_v20  ;;  %v1745_v20 = vld [vmem:[%s3009_s7 + $0x30] sm:$0xff] }
 0x2c2   : > { %2177 = vmatprep.subr.mxu1 %v2504_v26 }
 0x2c3   : > { %2166 = vmatmul.mubr.msk.f32.vlgmr.msra.gmra.mxu0 %vm662_vm4, %v644_v45  ;;  %2178 = vmatpush3.msra.mxu1 %v656_v21  ;;  %v1322_v45 = vld [vmem:[%s3006_s4 + $0x10] sm:$0xff]  ;;  %v1744_v21 = vld [vmem:[%s3009_s7 + $0x28] sm:$0xff] }
 0x2c4   : > { %2172 = vmatprep.mubr.msk.f32.mxu0 %vm2505_vm2, %v2504_v26  ;;  %2169 = vmatpush3.msra.mxu0 %v655_v3 }
 0x2c5   : > { %2170 = vmatprep.subr.mxu0 %v2504_v26  ;;  %2189 = vmatprep.subr.mxu1 %v2504_v26 }
 0x2c6   : > { %2171 = vmatpush3.msra.mxu0 %v654_v4 }
 0x2c7   : > { %2182 = vmatprep.subr.mxu0 %v2504_v26 }
 0x309   : > { %v737_v46 = vpop.f32.mrf.mxu0 }
 0x30a   : > { %v975_v47 = vmul.f32 0.35355338, %v737_v46 }
 0x30b   : > { %v2146_v48 = vpop.f32.mrf.mxu0 }
 0x30c   : > { %v980_v49 = vsel %vm979_vm5, %v975_v47, -inf }
 0x30d   : > { %981 = vmax.xlane.f32.xlu1 %v980_v49 }
 0x37b   : > { %v815_v50 = vpop.f32.mrf.mxu0 }
 0x37c   : > { %v976_v51 = vmul.f32 0.35355338, %v815_v50 }
 0x37d   : > { %v2153_v52 = vpop.f32.mrf.mxu0 }
 0x37e   : > { %v983_v53 = vsel %vm979_vm5, %v976_v51, -inf }
 0x37f   : > { %v893_v54 = vpop.f32.mrf.mxu1  ;;  %984 = vmax.xlane.f32.xlu0 %v983_v53 }
 0x380   : > { %v977_v55 = vmul.f32 0.35355338, %v893_v54 }
 0x381   : > { %v2160_v56 = vpop.f32.mrf.mxu1 }
 0x382   : > { %v986_v57 = vsel %vm979_vm5, %v977_v55, -inf }
 0x383   : > { %v971_v58 = vpop.f32.mrf.mxu0  ;;  %987 = vmax.xlane.f32.xlu0 %v986_v57 }
 0x384   : > { %v978_v59 = vmul.f32 0.35355338, %v971_v58 }
 0x385   : > { %v2167_v60 = vpop.f32.mrf.mxu0 }
 0x386   : > { %v989_v61 = vsel %vm979_vm5, %v978_v59, -inf }
 0x387   : > { %990 = vmax.xlane.f32.xlu1 %v989_v61  ;;  %v2036_v61 = vld [vmem:[%s3010_s8] ss:$0 sm:$0xff] }
 0x396   : > { %v982_v62 = vpop.xlane.xlu1 %981 }
 0x397   : > { %v992_v63 = vsub.f32 %v975_v47, %v982_v62 }
 0x399   : > { %v996_v0 = vmul.f32 1.442695, %v992_v63 }
 0x39b   : > { %2353 = vpow2.f32 %v996_v0 }
 0x3a8   : > { %v2354_v1 = vpop.eup %2353 }
 0x3a9   : > { %v1004_v2 = vsel %vm979_vm5, %v2354_v1, 0.0 }
 0x3aa   : > { %1005 = vadd.xlane.f32.xlu0 %v1004_v2 }
 0x408   : > { %v985_v5 = vpop.xlane.xlu0 %984 }
 0x409   : > { %v993_v6 = vsub.f32 %v976_v51, %v985_v5 }
 0x40b   : > { %v998_v7 = vmul.f32 1.442695, %v993_v6 }
 0x40c   : > { %v988_v8 = vpop.xlane.xlu0 %987 }
 0x40d   : > { %2355 = vpow2.f32 %v998_v7  ;;  %v994_v9 = vsub.f32 %v977_v55, %v988_v8  ;;  %v1657_v8 = vld [vmem:[%s3007_s5 + $0x18] sm:$0xff] }
 0x40f   : > { %v1000_v10 = vmul.f32 1.442695, %v994_v9  ;;  %v1655_v9 = vld [vmem:[%s3007_s5 + $0x8] sm:$0xff] }
 0x410   : > { %v991_v11 = vpop.xlane.xlu1 %990 }
 0x411   : > { %2357 = vpow2.f32 %v1000_v10  ;;  %v995_v12 = vsub.f32 %v978_v59, %v991_v11  ;;  %v1654_v10 = vld [vmem:[%s3007_s5] sm:$0xff]  ;;  %v1754_v11 = vld [vmem:[%s3009_s7 + $0x78] sm:$0xff] }
 0x413   : > { %v1002_v13 = vmul.f32 1.442695, %v995_v12  ;;  %v1753_v12 = vld [vmem:[%s3009_s7 + $0x70] sm:$0xff] }
 0x415   : > { %2359 = vpow2.f32 %v1002_v13  ;;  %v1752_v13 = vld [vmem:[%s3009_s7 + $0x68] sm:$0xff] }
 0x41a   : > { %v2356_v14 = vpop.eup %2355 }
 0x41b   : > { %v1007_v15 = vsel %vm979_vm5, %v2356_v14, 0.0 }
 0x41c   : > { %1008 = vadd.xlane.f32.xlu1 %v1007_v15  ;;  %v1750_v15 = vld [vmem:[%s3009_s7 + $0x58] sm:$0xff] }
 0x41e   : > { %v2358_v16 = vpop.eup %2357 }
 0x41f   : > { %v1010_v17 = vsel %vm979_vm5, %v2358_v16, 0.0 }
 0x420   : > { %1011 = vadd.xlane.f32.xlu0 %v1010_v17  ;;  %v1748_v17 = vld [vmem:[%s3009_s7 + $0x48] sm:$0xff] }
 0x422   : > { %v2360_v18 = vpop.eup %2359 }
 0x423   : > { %v1013_v19 = vsel %vm979_vm5, %v2360_v18, 0.0 }
 0x424   : > { %1014 = vadd.xlane.f32.xlu1 %v1013_v19  ;;  %v1746_v19 = vld [vmem:[%s3009_s7 + $0x38] sm:$0xff] }
 0x433   : > { %v1006_v22 = vpop.xlane.xlu0 %1005 }
 0x434   : > { %2361 = vrcp.f32 %v1006_v22  ;;  %v1743_v22 = vld [vmem:[%s3009_s7 + $0x20] sm:$0xff] }
 0x441   : > { %v2362_v23 = vpop.eup %2361 }
 0x442   : > { %v1020_v24 = vmul.f32 %v2362_v23, %v2354_v1  ;;  %v1742_v23 = vld [vmem:[%s3009_s7 + $0x18] sm:$0xff] }
 0x444   : > { %1024 = vst.msk [vmem:[%s2654_s29] sm:$0xff] %vm979_vm5, %v1020_v24  ;;  %2173 = vmatmul.mubr.msk.f32.vlgmr.msra.gmra.mxu0 %vm979_vm5, %v1020_v24 }
 0x445   : > { %2183 = vmatpush3.msra.mxu0 %v659_v25  ;;  %2186 = vmatprep.mubr.msk.f32.mxu0 %vm2505_vm2, %v2504_v26 }
 0x446   : > { %2184 = vmatprep.subr.mxu0 %v2504_v26 }
 0x447   : > { %2185 = vmatpush3.msra.mxu0 %v658_v27 }
 0x448   : > { %2196 = vmatprep.subr.mxu0 %v2504_v26 }
 0x4a5   : > { %v1009_v28 = vpop.xlane.xlu1 %1008 }
 0x4a6   : > { %2363 = vrcp.f32 %v1009_v28 }
 0x4a9   : > { %v1012_v29 = vpop.xlane.xlu0 %1011 }
 0x4aa   : > { %2365 = vrcp.f32 %v1012_v29  ;;  %v2037_v29 = vld [vmem:[%s3010_s8 + $0x2] ss:$0 sm:$0xff] }
 0x4ad   : > { %v1015_v31 = vpop.xlane.xlu1 %1014 }
 0x4ae   : > { %2367 = vrcp.f32 %v1015_v31 }
 0x4b3   : > { %v2364_v32 = vpop.eup %2363 }
 0x4b4   : > { %v1021_v33 = vmul.f32 %v2364_v32, %v2356_v14  ;;  %v1751_v14 = vld [vmem:[%s3009_s7 + $0x60] sm:$0xff] }
 0x4b5   : > { %v2038_v32 = vld [vmem:[%s3010_s8 + $0x3] ss:$0 sm:$0xff] }
 0x4b6   : > { %1025 = vst.msk [vmem:[%s2654_s29 + $0x8] sm:$0xff] %vm979_vm5, %v1021_v33  ;;  %2180 = vmatmul.mubr.msk.f32.vlgmr.msra.gmra.mxu1 %vm979_vm5, %v1021_v33 }
 0x4b7   : > { %v2366_v36 = vpop.eup %2365  ;;  %2190 = vmatpush3.msra.mxu1 %v661_v34  ;;  %2193 = vmatprep.mubr.msk.f32.mxu1 %vm2505_vm2, %v2504_v26 }
 0x4b8   : > { %v1022_v37 = vmul.f32 %v2366_v36, %v2358_v16  ;;  %2191 = vmatprep.subr.mxu1 %v2504_v26  ;;  %v1749_v16 = vld [vmem:[%s3009_s7 + $0x50] sm:$0xff]  ;;  %v1740_v36 = vld [vmem:[%s3009_s7 + $0x8] sm:$0xff] }
 0x4b9   : > { %2192 = vmatpush3.msra.mxu1 %v660_v35  ;;  %v1741_v35 = vld [vmem:[%s3009_s7 + $0x10] sm:$0xff] }
 0x4ba   : > { %1026 = vst.msk [vmem:[%s2654_s29 + $0x10] sm:$0xff] %vm979_vm5, %v1022_v37  ;;  %2187 = vmatmul.mubr.msk.f32.vlgmr.msra.gmra.mxu0 %vm979_vm5, %v1022_v37  ;;  %2201 = vmatprep.subr.mxu1 %v2504_v26  ;;  %v1739_v37 = vld [vmem:[%s3009_s7] sm:$0xff] }
 0x4bb   : > { %v2368_v39 = vpop.eup %2367  ;;  %2197 = vmatpush3.msra.mxu0 %v1321_v38  ;;  %2198 = vmatprep.mubr.msk.f32.mxu0 %vm2505_vm2, %v2504_v26  ;;  %v2039_v38 = vld [vmem:[%s3008_s6] ss:$0 sm:$0xff] }
 0x4bc   : > { %v1023_v40 = vmul.f32 %v2368_v39, %v2360_v18  ;;  %2206 = vmatprep.subr.mxu0 %v2504_v26  ;;  %v1747_v18 = vld [vmem:[%s3009_s7 + $0x40] sm:$0xff] }
 0x4be   : > { %1027 = vst.msk [vmem:[%s2654_s29 + $0x18] sm:$0xff] %vm979_vm5, %v1023_v40  ;;  %2194 = vmatmul.mubr.msk.f32.vlgmr.msra.gmra.mxu1 %vm979_vm5, %v1023_v40  ;;  %s2379_s29 = scalar_lea.vmem %s2378_s30, 1024 }
 0x4bf   : > { %2202 = vmatpush3.msra.mxu1 %v1320_v41  ;;  %2203 = vmatprep.mubr.msk.f32.mxu1 %vm2505_vm2, %v2504_v26  ;;  %p2381_p5 = scmp.lt.s32.totalorder %s2379_s29, %s2373_s21 }
 0x4c0   : > { %2211 = vmatprep.subr.mxu1 %v2504_v26 }
 0x4c1   : > { %p2382_p6 = por %p2381_p5, %p2380_p4 }
 0x4c3   : > { %p2383_p7 = pnand %p2382_p6, %p2376_p2 }
 0x504   : > { %v1097_v43 = vpop.f32.mrf.mxu0 }
 0x505   : > { %2204 = vmatmul.mubr.msk.f32.vlgmr.msra.gmra.mxu1 %vm662_vm4, %v1097_v43 }
 0x506   : > { %v2174_v44 = vpop.f32.mrf.mxu0  ;;  %2212 = vmatpush3.msra.mxu1 %v1323_v42  ;;  %2213 = vmatprep.mubr.msk.f32.mxu1 %vm2505_vm2, %v2504_v26 }
 0x507   : > { %2227 = vmatprep.subr.mxu1 %v2504_v26 }
 0x576   : > { %v1170_v46 = vpop.f32.mrf.mxu1 }
 0x577   : > { %2199 = vmatmul.mubr.msk.f32.vlgmr.msra.gmra.mxu0 %vm662_vm4, %v1170_v46 }
 0x578   : > { %v2181_v47 = vpop.f32.mrf.mxu1  ;;  %2207 = vmatpush3.msra.mxu0 %v1322_v45  ;;  %2208 = vmatprep.mubr.msk.f32.mxu0 %vm2505_vm2, %v2504_v26 }
 0x579   : > { %2216 = vmatprep.subr.mxu0 %v2504_v26 }
 0x57a   : > { %v1243_v48 = vpop.f32.mrf.mxu0 }
 0x57b   : > { %2209 = vmatmul.mubr.msk.f32.vlgmr.msra.gmra.mxu0 %vm662_vm4, %v1243_v48 }
 0x57c   : > { %v2188_v49 = vpop.f32.mrf.mxu0  ;;  %2224 = vmatprep.mubr.msk.f32.mxu0 %vm2505_vm2, %v2504_v26  ;;  %2217 = vmatpush3.msra.mxu0 %v1657_v8 }
 0x57d   : > { %2218 = vmatprep.subr.mxu0 %v2504_v26 }
 0x57e   : > { %v1316_v50 = vpop.f32.mrf.mxu1 }
 0x57f   : > { %2214 = vmatmul.mubr.msk.f32.vlgmr.msra.gmra.mxu1 %vm662_vm4, %v1316_v50 }
 0x580   : > { %v2195_v51 = vpop.f32.mrf.mxu1  ;;  %2259 = vmatprep.mubr.msk.f32.mxu1 %vm2505_vm2, %v2504_v26  ;;  %2228 = vmatpush3.msra.mxu1 %v1754_v11 }
 0x581   : > { %2229 = vmatprep.subr.mxu1 %v2504_v26 }
 0x582   : > { %2230 = vmatpush3.msra.mxu1 %v1753_v12 }
 0x583   : > { %2231 = vmatprep.subr.mxu1 %v2504_v26 }
 0x584   : > { %2232 = vmatpush3.msra.mxu1 %v1752_v13 }
 0x585   : > { %2233 = vmatprep.subr.mxu1 %v2504_v26 }
 0x586   : > { %2234 = vmatpush3.msra.mxu1 %v1751_v14 }
 0x587   : > { %2235 = vmatprep.subr.mxu1 %v2504_v26 }
 0x588   : > { %2236 = vmatpush3.msra.mxu1 %v1750_v15 }
 0x589   : > { %2237 = vmatprep.subr.mxu1 %v2504_v26 }
 0x58a   : > { %2238 = vmatpush3.msra.mxu1 %v1749_v16 }
 0x58b   : > { %2239 = vmatprep.subr.mxu1 %v2504_v26 }
 0x58c   : > { %2240 = vmatpush3.msra.mxu1 %v1748_v17 }
 0x58d   : > { %2241 = vmatprep.subr.mxu1 %v2504_v26 }
 0x58e   : > { %2242 = vmatpush3.msra.mxu1 %v1747_v18 }
 0x58f   : > { %2243 = vmatprep.subr.mxu1 %v2504_v26 }
 0x590   : > { %2244 = vmatpush3.msra.mxu1 %v1746_v19 }
 0x591   : > { %2245 = vmatprep.subr.mxu1 %v2504_v26 }
 0x592   : > { %2246 = vmatpush3.msra.mxu1 %v1745_v20 }
 0x593   : > { %2247 = vmatprep.subr.mxu1 %v2504_v26 }
 0x594   : > { %2248 = vmatpush3.msra.mxu1 %v1744_v21 }
 0x595   : > { %2249 = vmatprep.subr.mxu1 %v2504_v26 }
 0x596   : > { %2250 = vmatpush3.msra.mxu1 %v1743_v22 }
 0x597   : > { %2251 = vmatprep.subr.mxu1 %v2504_v26 }
 0x598   : > { %2252 = vmatpush3.msra.mxu1 %v1742_v23 }
 0x599   : > { %2253 = vmatprep.subr.mxu1 %v2504_v26 }
 0x59a   : > { %2254 = vmatpush3.msra.mxu1 %v1741_v35 }
 0x59b   : > { %2255 = vmatprep.subr.mxu1 %v2504_v26 }
 0x59c   : > { %2256 = vmatpush3.msra.mxu1 %v1740_v36 }
 0x59d   : > { %2257 = vmatprep.subr.mxu1 %v2504_v26 }
 0x59e   : > { %2258 = vmatpush3.msra.mxu1 %v1739_v37 }
 0x5c5   : > { %v1466_v52 = vpop.f32.mrf.mxu1 }
 0x5c7   : > { %v2205_v53 = vpop.f32.mrf.mxu1 }
 0x637   : > { %v1393_v54 = vpop.f32.mrf.mxu0 }
 0x638   : > { %v1467_v56 = vadd.f32 %v1466_v52, %v1393_v54 }
 0x639   : > { %v2200_v55 = vpop.f32.mrf.mxu0 }
 0x63b   : > { %v1539_v57 = vpop.f32.mrf.mxu0 }
 0x63c   : > { %v1543_v58 = vadd.f32 %v1539_v57, %v1467_v56 }
 0x63d   : > { %v2210_v59 = vpop.f32.mrf.mxu0 }
 0x63f   : > { %v1613_v60 = vpop.f32.mrf.mxu1 }
 0x640   : > { %v1617_v62 = vadd.f32 %v1613_v60, %v1543_v58 }
 0x641   : > { %v2215_v63 = vpop.f32.mrf.mxu1 }
 0x642   : > { %v1628_v0 = vadd.f32 %v2036_v61, %v1617_v62 }
 0x644   : > { %v1629_v1 = vadd.f32 %v1628_v0, %v2712_v30  ;;  %v1656_v30 = vld [vmem:[%s3007_s5 + $0x10] sm:$0xff] }
 0x645   : > { %2219 = vmatpush3.msra.mxu0 %v1656_v30 }
 0x646   : > { %v1630_v2 = vsel %vm564_vm3, %v1629_v1, 0.0  ;;  %2220 = vmatprep.subr.mxu0 %v2504_v26 }
 0x647   : > { %1631 = vadd.xlane.f32.xlu0 %v1630_v2  ;;  %2221 = vmatpush3.msra.mxu0 %v1655_v9 }
 0x648   : > { %2222 = vmatprep.subr.mxu0 %v2504_v26  ;;  %v2041_v26 = vld [vmem:[%s3010_s8 + $0x1] ss:$0 sm:$0xff] }
 0x649   : > { %2223 = vmatpush3.msra.mxu0 %v1654_v10 }
 0x6d0   : > { %v1632_v3 = vpop.xlane.xlu0 %1631 }
 0x6d1   : > { %v1634_v4 = vmul.f32 0.03125, %v1632_v3 }
 0x6d3   : > { %v1635_v5 = vsub.f32 %v1629_v1, %v1634_v4 }
 0x6d5   : > { %v1636_v6 = vmul.f32 %v1635_v5, %v1635_v5 }
 0x6d7   : > { %v1637_v7 = vsel %vm564_vm3, %v1636_v6, 0.0 }
 0x6d8   : > { %1638 = vadd.xlane.f32.xlu1 %v1637_v7 }
 0x761   : > { %v1639_v24 = vpop.xlane.xlu1 %1638 }
 0x762   : > { %v1640_v25 = vmul.f32 0.03125, %v1639_v24 }
 0x764   : > { %v1641_v27 = vadd.f32 1e-05, %v1640_v25 }
 0x766   : > { %2369 = vrsqrt.f32 %v1641_v27 }
 0x773   : > { %v2370_v28 = vpop.eup %2369 }
 0x774   : > { %v1643_v31 = vmul.f32 %v2370_v28, %v1635_v5 }
 0x776   : > { %v1648_v33 = vmul.f32 %v2037_v29, %v1643_v31 }
 0x778   : > { %v1653_v34 = vadd.f32 %v2038_v32, %v1648_v33 }
 0x77a   : > { %2225 = vmatmul.mubr.msk.f32.vlgmr.msra.gmra.mxu0 %vm564_vm3, %v1653_v34 }
 0x83a   : > { %v1734_v39 = vpop.f32.mrf.mxu0 }
 0x83b   : > { %v1735_v40 = vadd.f32 %v2039_v38, %v1734_v39 }
 0x83c   : > { %v2226_v41 = vpop.f32.mrf.mxu0 }
 0x83d   : > { %v1738_v42 = vmax.f32 %v1735_v40, 0.0 }
 0x83f   : > { %2260 = vmatmul.mubr.f32.vlgmr.msra.gmra.mxu1 %v1738_v42 }
 0x8ff   : > { %v1825_v43 = vpop.f32.mrf.mxu1 }
 0x900   : > { %v1826_v44 = vadd.f32 %v2041_v26, %v1825_v43 }
 0x901   : > { %v2261_v45 = vpop.f32.mrf.mxu1 }
 0x902   : > { %v1829_v46 = vadd.f32 %v1826_v44, %v1653_v34 }
 0x904   : > { %v1830_v47 = vsel %vm564_vm3, %v1829_v46, 0.0 }
 0x905   : > { %1831 = vadd.xlane.f32.xlu0 %v1830_v47 }
 0x98e   : > { %v1832_v48 = vpop.xlane.xlu0 %1831 }
 0x98f   : > { %v1833_v49 = vmul.f32 0.03125, %v1832_v48 }
 0x991   : > { %v1834_v50 = vsub.f32 %v1829_v46, %v1833_v49 }
 0x993   : > { %v1835_v51 = vmul.f32 %v1834_v50, %v1834_v50 }
 0x995   : > { %v1836_v52 = vsel %vm564_vm3, %v1835_v51, 0.0 }
 0x996   : > { %1837 = vadd.xlane.f32.xlu1 %v1836_v52 }
 0x997   : > { %2386 = shalt.err (!%p2383_p7)
}
 0x998   : > { %s2387_s23 = scalar_lea.hbm %s2920_s15, 512  ;;  %s2391_s11 = scalar_lea.hbm %s3012_s10, 2048 }
 0x999   : > { %p2388_p9 = scmp.ne.s32.totalorder %s2920_s15, %s2387_s23  ;;  %p2392_p12 = scmp.lt.s32.totalorder %s2920_s15, %s3012_s10 }
 0x99a   : > { %p2393_p13 = scmp.lt.s32.totalorder %s2391_s11, %s2387_s23 }
 0x99b   : > { %p2389_p10 = pnand %p2388_p9, %p2620_p3 }
 0x99c   : > { %p2394_p0 = por %p2393_p13, %p2392_p12 }
 0x99d   : > { %p2390_p11 = pneg %p2389_p10 }
 0x99f   : > { %p2395_p1 = pnand %p2394_p0, %p2390_p11 }
 0x9a1   : > { %2398 = shalt.err (!%p2395_p1)
}
 0x9a2   : > { %s2510_s21 = smov 128   ;;  %s2511_s30 = smov 256   ;;  %v2042_v57 = vld [vmem:[%s3010_s8 + $0x4] ss:$0 sm:$0xff]  ;;  %v2043_v59 = vld [vmem:[%s3010_s8 + $0x5] ss:$0 sm:$0xff] }
 0x9a3   : > { %s2512_s29 = smov 8   ;;  %s3028_s18 = scalar_lea.sflag [#allocation6], %s2641_s12 }
 0x9a4   : > { %2263 = dma.vmem_to_hbm [thread:$0]  (%p2620_p3), %s2922_s19, 512, %s2920_s15, %s3028_s18, %s2510_s21, %s2511_s30, %s2512_s29  }
 0x9a5   : > { %s2046_s25 = sshll.u32 %s2483_s17, 1  ;;  %s1875_s15 = sshll.u32 %s2652_s28, 4  ;;  %s1876_s15 = int_to_ptr.vmem [resolvable:$true] %s1875_s15 }
 0x9a6   : > { %s1871_s23 = sadd.s32 %s2479_s16, %s2046_s25  ;;  %s1855_s16 = scalar_lea.sflag [#allocation4], %s2641_s12 }
 0x9a7   : > { %s2047_s19 = sshll.u32 %s1871_s23, 7  ;;  %s2399_s29 = scalar_lea.vmem %s1876_s15, 128 }
 0x9a8   : > { %s1873_s17 = scalar_lea.hbm %s3011_s9, %s2047_s19  ;;  %p2400_p2 = scmp.ne.s32.totalorder %s1876_s15, %s2399_s29 }
 0x9a9   : > { %s2513_s18 = smov [#allocation3]  }
 0x9aa   : > { %p2401_p4 = pnand %p2400_p2, %p2620_p3  ;;  %s2403_s0 = sshll.u32 %s2513_s18, 4  ;;  %s2404_s0 = int_to_ptr.vmem [resolvable:$false] %s2403_s0 }
 0x9ab   : > { %s2405_s25 = scalar_lea.vmem %s2404_s0, 256  ;;  %p2406_p6 = scmp.lt.s32.totalorder %s1876_s15, %s2404_s0 }
 0x9ac   : > { %p2402_p5 = pneg %p2401_p4  ;;  %p2407_p7 = scmp.lt.s32.totalorder %s2405_s25, %s2399_s29 }
 0x9ae   : > { %p2408_p9 = por %p2407_p7, %p2406_p6 }
 0x9b0   : > { %p2409_p10 = pnand %p2408_p9, %p2402_p5 }
 0xa1f   : > { %v1838_v53 = vpop.xlane.xlu1 %1837 }
 0xa20   : > { %v1839_v54 = vmul.f32 0.03125, %v1838_v53 }
 0xa22   : > { %v1840_v55 = vadd.f32 1e-05, %v1839_v54 }
 0xa24   : > { %2371 = vrsqrt.f32 %v1840_v55 }
 0xa31   : > { %v2372_v56 = vpop.eup %2371 }
 0xa32   : > { %v1842_v58 = vmul.f32 %v2372_v56, %v1834_v50 }
 0xa34   : > { %v1847_v60 = vmul.f32 %v2042_v57, %v1842_v58 }
 0xa36   : > { %v1852_v61 = vadd.f32 %v2043_v59, %v1847_v60 }
 0xa38   : > { %1853 = vst.msk [vmem:[%s2652_s28] sm:$0xff] %vm564_vm3, %v1852_v61 }
 0xa39   : > { %2412 = shalt.err (!%p2409_p10)
}
 0xa3a   : > { %s2413_s23 = scalar_lea.hbm %s1873_s17, 128  ;;  %s2417_s24 = scalar_lea.hbm %s3011_s9, 512 }
 0xa3b   : > { %p2414_p11 = scmp.ne.s32.totalorder %s1873_s17, %s2413_s23  ;;  %p2418_p0 = scmp.lt.s32.totalorder %s1873_s17, %s3011_s9 }
 0xa3c   : > { %p2419_p1 = scmp.lt.s32.totalorder %s2417_s24, %s2413_s23 }
 0xa3d   : > { %p2415_p12 = pnand %p2414_p11, %p2620_p3 }
 0xa3e   : > { %p2420_p2 = por %p2419_p1, %p2418_p0 }
 0xa3f   : > { %p2416_p13 = pneg %p2415_p12 }
 0xa41   : > { %p2421_p4 = pnand %p2420_p2, %p2416_p13 }
 0xa43   : > { %2424 = shalt.err (!%p2421_p4)
}
 0xa44   : > { %2262 = dma.vmem_to_hbm [thread:$0]  (%p2620_p3), %s1876_s15, 128, %s1873_s17, %s1855_s16  }
 0xa45 PF: > { %p2273_p5 = scmp.ge.s32.totalorder %s2495_s20, 2  ;;  %s1904_s19 = sand.u32 1, %s2467_s13  }
 0xa46   : > { %s1905_s21 = scalar_lea.sflag [#allocation4], %s1904_s19 }
 0xa47   : > { %p2267_p6 = pnand %p2273_p5, %p2629_p8 }
 0xa49   : > { %p2268_p7 = pneg %p2267_p6 }
 0xa4b   : > { %2458 = dma.done.wait (%p2268_p7), %s1905_s21, 128  }
 0xa4c   : > { %2460 = vsyncadd (%p2268_p7), %s1905_s21, 4294967168  ;;  %s1914_s30 = scalar_lea.sflag [#allocation6], %s1904_s19 }
 0xa4d   : > { %2462 = dma.done.wait (%p2268_p7), %s1914_s30, 512  }
 0xa4e   : > { %2464 = vsyncadd (%p2268_p7), %s1914_s30, 4294966784  ;;  %s27_s20 = sadd.s32 1, %s2495_s20   ;;  %s3029_s26 = sld [smem:[#allocation9_spill]] }
 0xa4f   : > { %p24_p9 = scmp.ge.s32.totalorder %s27_s20, 6   ;;  %s3030_s15 = sld [smem:[#allocation14_spill]] }
 0xa50   : > { %s3031_s16 = sld [smem:[#allocation10_spill]]  ;;  %s3035_s13 = smov %s2471_s14 }
 0xa51   : > { %s3032_s17 = sld [smem:[#allocation11_spill]]  ;;  %26 = sbr.rel (!%p24_p9) target bundleno = 9 (0x9), region = 121 }
 0xa52   : > { %s3033_s18 = sld [smem:[#allocation12_spill]] }
 0xa53   : > { %s3034_s19 = sld [smem:[#allocation13_spill]] }
 0xa54   : > { %s3036_s14 = smov %s3029_s26 }
 0xa56   :  { %1919 = vsyncpa [#allocation4], 1 }
 0xa57   :  { %1921 = vsyncpa [#allocation4 + $0x1], 1 }
 0xa58   :  { %1922 = vsyncpa [#allocation6], 1 }
 0xa59   :  { %1924 = vsyncpa [#allocation6 + $0x1], 1 }

</bundles_post_ra>
